<compile_context>
chip_gen: v5e
topology: v5e:2x2
jax: 0.10.0
libtpu: 0.0.40
codegen_flags: <defaults>
</compile_context>

<pallas_src>
import jax
import jax.numpy as jnp
from jax import lax
from jax.experimental import pallas as pl
from jax.experimental.pallas import tpu as pltpu

EPS = 1e-5


def fusion_kernel(t_ref, f_ref, w_ref, v_ref, out_ref):
    # t_ref, f_ref, out_ref: [B, C, HW]   (HW on lanes, C on sublanes)
    # w_ref: [4, C, C]  zero-padded 1x1-conv weights, (out, in) orientation:
    #        0: local conv1, 1: local conv2, 2: global conv1, 3: global conv2
    # v_ref: [C, 8]     columns: lg1, lbt1, lg2, lbt2, gg1, gbt1, gg2, gbt2
    t = t_ref[...]
    f = f_ref[...]
    B, C, _ = t.shape

    w = w_ref[...]                       # [4, C, C]
    v = v_ref[...]                       # [C, 8]

    def gb(j):                           # gamma/beta column j -> [1, C, 1]
        return v[:, j:j + 1][None]

    def bn_fold(x, j):
        # Training-mode BatchNorm over (batch, spatial).  Center first, then
        # apply one fused per-channel scale + shift (matches the reference's
        # E[(x-mean)^2] variance exactly — no cancellation).
        mean = jnp.mean(x, axis=(0, 2), keepdims=True)              # [1, C, 1]
        c = x - mean
        var = jnp.mean(c * c, axis=(0, 2), keepdims=True)           # [1, C, 1]
        scale = gb(j) * lax.rsqrt(var + EPS)                        # EUP rsqrt
        return c * scale + gb(j + 1)

    def conv1x1(k, x):
        # Channel-mixing 1x1 conv as a batched MXU matmul over the sublane
        # axis (blessed batched-einsum lowering; weight broadcast is free-ish
        # for [4, 8, 8]).
        wk = jnp.broadcast_to(w[k][None], (B, C, C))                # [B, C, C]
        return jnp.einsum('boi,bin->bon', wk, x,
                          preferred_element_type=jnp.float32)

    def pooled_conv(k, x):
        # Same conv on the pooled [B, C, 1] tensor.  N == 1, so do it as C
        # broadcast-MACs on tiny vregs instead of a degenerate MXU matmul.
        wk = w[k]                                                   # [C, C]
        acc = wk[:, 0:1][None] * x[:, 0:1, :]
        for i in range(1, C):
            acc = acc + wk[:, i:i + 1][None] * x[:, i:i + 1, :]
        return acc                                                  # [B, C, 1]

    xa = t + f

    # ---- Local_Att: conv1x1 -> BN -> ReLU -> conv1x1 -> BN  (biases cancel)
    h = jnp.maximum(bn_fold(conv1x1(0, xa), 0), 0.0)
    xl = bn_fold(conv1x1(1, h), 2)                                  # [B, C, HW]

    # ---- Global_Att: GAP(1) -> conv1x1 -> BN -> ReLU -> conv1x1 -> BN
    xp = jnp.mean(xa, axis=2, keepdims=True)                        # [B, C, 1]
    g = jnp.maximum(bn_fold(pooled_conv(2, xp), 4), 0.0)
    xg = bn_fold(pooled_conv(3, g), 6)                              # [B, C, 1]

    # ---- fuse: softmax over channels (sublane axis), convex blend
    xlg = xl + xg                                                   # lane bcast
    m = jnp.max(xlg, axis=1, keepdims=True)
    e = jnp.exp(xlg - m)
    s = jnp.sum(e, axis=1, keepdims=True)
    wei = e * pl.reciprocal(s, approx=False)
    # t*wei + f*(1-wei) == f + (t-f)*wei  -> one fewer full-tile multiply.
    out_ref[...] = f + (t - f) * wei


def _pack_params(params, C):
    """Pack 1x1-conv weights and BN gamma/beta into two zero-padded slabs."""
    def pad_w(wt):                      # [out, in] -> [C, C]
        o, i = wt.shape
        return jnp.zeros((C, C), jnp.float32).at[:o, :i].set(
            wt.astype(jnp.float32))

    w_slab = jnp.stack([pad_w(params['lw1']), pad_w(params['lw2']),
                        pad_w(params['gw1']), pad_w(params['gw2'])], axis=0)

    def pad_v(vec):                     # [n] -> [C]
        vec = jnp.asarray(vec, jnp.float32).reshape(-1)
        return jnp.zeros((C,), jnp.float32).at[:vec.shape[0]].set(vec)

    cols = ('lg1', 'lbt1', 'lg2', 'lbt2', 'gg1', 'gbt1', 'gg2', 'gbt2')
    v_slab = jnp.stack([pad_v(params[k]) for k in cols], axis=1)    # [C, 8]
    return w_slab, v_slab


def _full_spec(shape):
    nd = len(shape)
    return pl.BlockSpec(shape, lambda i, _nd=nd: (0,) * _nd)


def fusion_all_forward(t_nchw, f_nchw, params):
    """t, f: [B, C, H, W] float32 (PyTorch NCHW). Returns [B, C, H, W]."""
    B, C, H, W = t_nchw.shape
    HW = H * W
    inter = params['lw1'].shape[0]
    # Zero-padding trick in the kernel needs inter_channels <= out_channels.
    assert inter <= C

    # Free, contiguous reshapes — no transposes anywhere in the wrapper.
    t_ = t_nchw.reshape(B, C, HW).astype(jnp.float32)
    f_ = f_nchw.reshape(B, C, HW).astype(jnp.float32)
    w_slab, v_slab = _pack_params(params, C)

    cost = pl.CostEstimate(
        flops=4 * B * HW * C * C + 24 * B * C * HW,
        transcendentals=B * C * HW,
        bytes_accessed=4 * (3 * B * C * HW + 4 * C * C + 8 * C))

    # Toy sizes: everything (3 * 16 KiB activations + <1.5 KiB params) fits
    # comfortably in VMEM -> single full-block invocation; the kernel is
    # launch/DMA-overhead bound, so there is nothing to pipeline.  At
    # production sizes, tile over HW with a two-pass BN (sum/sumsq then
    # normalize) and a "parallel" grid axis so v7x's two TensorCores /
    # 64 MiB VMEM are used.
    out = pl.pallas_call(
        fusion_kernel,
        out_shape=jax.ShapeDtypeStruct((B, C, HW), jnp.float32),
        grid=(1,),
        in_specs=[_full_spec(t_.shape), _full_spec(f_.shape),
                  _full_spec(w_slab.shape), _full_spec(v_slab.shape)],
        out_specs=_full_spec((B, C, HW)),
        compiler_params=pltpu.CompilerParams(
            dimension_semantics=("arbitrary",)),
        cost_estimate=cost,
    )(t_, f_, w_slab, v_slab)

    return out.reshape(B, C, H, W)


def reference_forward(t, f, p):
    """Pure-JAX NCHW reference mirroring the PyTorch module (training-mode BN,
    including the conv biases that the kernel folds away)."""
    xa = t + f

    def bn(x, gamma, beta, axes):
        mean = jnp.mean(x, axis=axes, keepdims=True)
        var = jnp.mean(jnp.square(x - mean), axis=axes, keepdims=True)
        return (x - mean) / jnp.sqrt(var + EPS) * gamma + beta

    def c4(vec):                      # [n] -> [1, n, 1, 1]
        return vec[None, :, None, None]

    # local branch
    h = jnp.einsum('oc,bchw->bohw', p['lw1'], xa) + c4(p['lb1'])
    h = bn(h, c4(p['lg1']), c4(p['lbt1']), axes=(0, 2, 3))
    h = jnp.maximum(h, 0.0)
    xl = jnp.einsum('oi,bihw->bohw', p['lw2'], h) + c4(p['lb2'])
    xl = bn(xl, c4(p['lg2']), c4(p['lbt2']), axes=(0, 2, 3))

    # global branch
    xp = jnp.mean(xa, axis=(2, 3))
    g = jnp.einsum('oc,bc->bo', p['gw1'], xp) + p['gb1']
    g = bn(g, p['gg1'], p['gbt1'], axes=(0,))
    g = jnp.maximum(g, 0.0)
    xg = jnp.einsum('oi,bi->bo', p['gw2'], g) + p['gb2']
    xg = bn(xg, p['gg2'], p['gbt2'], axes=(0,))

    xlg = xl + xg[:, :, None, None]
    wei = jax.nn.softmax(xlg, axis=1)
    return t * wei + f * (1.0 - wei)


if __name__ == "__main__":
    # Module config: in_channels = out_channels = 8, ratio = 2, limitation = 4
    B, C, H, W = 2, 8, 16, 16
    ratio, limitation = 2, 4
    inter = max(C // ratio, limitation)         # = 4

    key = jax.random.PRNGKey(0)
    keys = jax.random.split(key, 20)

    def rnd(k, shape, scale=0.2):
        return scale * jax.random.normal(k, shape, dtype=jnp.float32)

    # Conv weights in PyTorch [out, in] orientation; BN params as 1-D vectors.
    params = {
        "lw1": rnd(keys[0], (inter, C)), "lb1": rnd(keys[1], (inter,)),
        "lg1": 1.0 + rnd(keys[2], (inter,)), "lbt1": rnd(keys[3], (inter,)),
        "lw2": rnd(keys[4], (C, inter)), "lb2": rnd(keys[5], (C,)),
        "lg2": 1.0 + rnd(keys[6], (C,)), "lbt2": rnd(keys[7], (C,)),
        "gw1": rnd(keys[8], (inter, C)), "gb1": rnd(keys[9], (inter,)),
        "gg1": 1.0 + rnd(keys[10], (inter,)), "gbt1": rnd(keys[11], (inter,)),
        "gw2": rnd(keys[12], (C, inter)), "gb2": rnd(keys[13], (C,)),
        "gg2": 1.0 + rnd(keys[14], (C,)), "gbt2": rnd(keys[15], (C,)),
    }

    # Forward input x with x[0] = t, x[1] = f, each [B, C, H, W].
    t = jax.random.normal(keys[16], (B, C, H, W), dtype=jnp.float32)
    f = jax.random.normal(keys[17], (B, C, H, W), dtype=jnp.float32)

    out = jax.block_until_ready(fusion_all_forward(t, f, params))

    ref = reference_forward(t, f, params)
    max_err = float(jnp.max(jnp.abs(out - ref)))
    assert out.shape == (B, C, H, W)
    assert jnp.allclose(out, ref, atol=1e-4, rtol=1e-4), max_err

    print("KERNEL_OK")
</pallas_src>

<mosaic_0001>
module attributes {stable_mosaic.version = 11 : i64} {
  func.func @fusion_kernel(%arg0: i32, %arg1: memref<2x8x256xf32, #tpu.memory_space<vmem>>, %arg2: memref<2x8x256xf32, #tpu.memory_space<vmem>>, %arg3: memref<4x8x8xf32, #tpu.memory_space<vmem>>, %arg4: memref<8x8xf32, #tpu.memory_space<vmem>>, %arg5: memref<2x8x256xf32, #tpu.memory_space<vmem>>) attributes {dimension_semantics = [#tpu.dimension_semantics<arbitrary>], iteration_bounds = array<i64: 1>, scalar_prefetch = 0 : i64, scratch_operands = 0 : i64, tpu.core_type = #tpu.core_type<tc>, window_params = [{pipeline_mode = #tpu.pipeline_mode<synchronous>, transform_indices = @transform_0, window_bounds = array<i64: 2, 8, 256>}, {pipeline_mode = #tpu.pipeline_mode<synchronous>, transform_indices = @transform_1, window_bounds = array<i64: 2, 8, 256>}, {pipeline_mode = #tpu.pipeline_mode<synchronous>, transform_indices = @transform_2, window_bounds = array<i64: 4, 8, 8>}, {pipeline_mode = #tpu.pipeline_mode<synchronous>, transform_indices = @transform_3, window_bounds = array<i64: 8, 8>}, {pipeline_mode = #tpu.pipeline_mode<synchronous>, transform_indices = @transform_4, window_bounds = array<i64: 2, 8, 256>}]} {
    %c0 = arith.constant 0 : index
    %c0_0 = arith.constant 0 : index
    %c0_1 = arith.constant 0 : index
    %0 = vector.load %arg1[%c0, %c0_0, %c0_1] : memref<2x8x256xf32, #tpu.memory_space<vmem>>, vector<2x8x256xf32>
    %c0_2 = arith.constant 0 : index
    %c0_3 = arith.constant 0 : index
    %c0_4 = arith.constant 0 : index
    %1 = vector.load %arg2[%c0_2, %c0_3, %c0_4] : memref<2x8x256xf32, #tpu.memory_space<vmem>>, vector<2x8x256xf32>
    %c0_5 = arith.constant 0 : index
    %c0_6 = arith.constant 0 : index
    %c0_7 = arith.constant 0 : index
    %2 = vector.load %arg3[%c0_5, %c0_6, %c0_7] : memref<4x8x8xf32, #tpu.memory_space<vmem>>, vector<4x8x8xf32>
    %c0_8 = arith.constant 0 : index
    %c0_9 = arith.constant 0 : index
    %3 = vector.load %arg4[%c0_8, %c0_9] : memref<8x8xf32, #tpu.memory_space<vmem>>, vector<8x8xf32>
    %4 = arith.addf %0, %1 : vector<2x8x256xf32>
    %5 = vector.extract_strided_slice %2 {offsets = [0, 0, 0], sizes = [1, 8, 8], strides = [1, 1, 1]} : vector<4x8x8xf32> to vector<1x8x8xf32>
    %6 = vector.shape_cast %5 : vector<1x8x8xf32> to vector<8x8xf32>
    %7 = vector.shape_cast %6 : vector<8x8xf32> to vector<1x8x8xf32>
    %8 = vector.shape_cast %7 : vector<1x8x8xf32> to vector<1x8x8xf32>
    %9 = vector.broadcast %8 : vector<1x8x8xf32> to vector<2x8x8xf32>
    "tpu.trace_start"() <{level = 10 : i32, message = "boi,bin->bon"}> : () -> ()
    %cst = arith.constant dense<0.000000e+00> : vector<2x8x256xf32>
    %10 = tpu.matmul %9, %4, %cst {dimension_numbers = #tpu.dot_dimension_numbers<[2], [1], [1], [2], [0, 0, 0, 1, 1, 2], [0], [0]>} : vector<2x8x8xf32>, vector<2x8x256xf32>, vector<2x8x256xf32> -> vector<2x8x256xf32>
    "tpu.trace_stop"() : () -> ()
    %cst_10 = arith.constant dense<0.000000e+00> : vector<8xf32>
    %11 = vector.multi_reduction <add>, %10, %cst_10 [0, 2] : vector<2x8x256xf32> to vector<8xf32>
    %12 = vector.shape_cast %11 : vector<8xf32> to vector<1x8x1xf32>
    %cst_11 = arith.constant 5.120000e+02 : f32
    %13 = vector.broadcast %cst_11 : f32 to vector<1x8x1xf32>
    %14 = arith.divf %12, %13 : vector<1x8x1xf32>
    %15 = vector.broadcast %14 : vector<1x8x1xf32> to vector<2x8x256xf32>
    %16 = arith.subf %10, %15 : vector<2x8x256xf32>
    %17 = arith.mulf %16, %16 : vector<2x8x256xf32>
    %cst_12 = arith.constant dense<0.000000e+00> : vector<8xf32>
    %18 = vector.multi_reduction <add>, %17, %cst_12 [0, 2] : vector<2x8x256xf32> to vector<8xf32>
    %19 = vector.shape_cast %18 : vector<8xf32> to vector<1x8x1xf32>
    %cst_13 = arith.constant 5.120000e+02 : f32
    %20 = vector.broadcast %cst_13 : f32 to vector<1x8x1xf32>
    %21 = arith.divf %19, %20 : vector<1x8x1xf32>
    %22 = vector.extract_strided_slice %3 {offsets = [0, 0], sizes = [8, 1], strides = [1, 1]} : vector<8x8xf32> to vector<8x1xf32>
    %23 = vector.shape_cast %22 : vector<8x1xf32> to vector<1x8x1xf32>
    %cst_14 = arith.constant 9.99999974E-6 : f32
    %24 = vector.broadcast %cst_14 : f32 to vector<1x8x1xf32>
    %25 = arith.addf %21, %24 : vector<1x8x1xf32>
    %26 = math.rsqrt %25 : vector<1x8x1xf32>
    %27 = arith.mulf %23, %26 : vector<1x8x1xf32>
    %28 = vector.broadcast %27 : vector<1x8x1xf32> to vector<2x8x256xf32>
    %29 = arith.mulf %16, %28 : vector<2x8x256xf32>
    %30 = vector.extract_strided_slice %3 {offsets = [0, 1], sizes = [8, 1], strides = [1, 1]} : vector<8x8xf32> to vector<8x1xf32>
    %31 = vector.shape_cast %30 : vector<8x1xf32> to vector<1x8x1xf32>
    %32 = vector.broadcast %31 : vector<1x8x1xf32> to vector<2x8x256xf32>
    %33 = arith.addf %29, %32 : vector<2x8x256xf32>
    %cst_15 = arith.constant 0.000000e+00 : f32
    %34 = vector.broadcast %cst_15 : f32 to vector<2x8x256xf32>
    %35 = arith.maximumf %33, %34 : vector<2x8x256xf32>
    %36 = vector.extract_strided_slice %2 {offsets = [1, 0, 0], sizes = [1, 8, 8], strides = [1, 1, 1]} : vector<4x8x8xf32> to vector<1x8x8xf32>
    %37 = vector.shape_cast %36 : vector<1x8x8xf32> to vector<8x8xf32>
    %38 = vector.shape_cast %37 : vector<8x8xf32> to vector<1x8x8xf32>
    %39 = vector.shape_cast %38 : vector<1x8x8xf32> to vector<1x8x8xf32>
    %40 = vector.broadcast %39 : vector<1x8x8xf32> to vector<2x8x8xf32>
    "tpu.trace_start"() <{level = 10 : i32, message = "boi,bin->bon"}> : () -> ()
    %cst_16 = arith.constant dense<0.000000e+00> : vector<2x8x256xf32>
    %41 = tpu.matmul %40, %35, %cst_16 {dimension_numbers = #tpu.dot_dimension_numbers<[2], [1], [1], [2], [0, 0, 0, 1, 1, 2], [0], [0]>} : vector<2x8x8xf32>, vector<2x8x256xf32>, vector<2x8x256xf32> -> vector<2x8x256xf32>
    "tpu.trace_stop"() : () -> ()
    %cst_17 = arith.constant dense<0.000000e+00> : vector<8xf32>
    %42 = vector.multi_reduction <add>, %41, %cst_17 [0, 2] : vector<2x8x256xf32> to vector<8xf32>
    %43 = vector.shape_cast %42 : vector<8xf32> to vector<1x8x1xf32>
    %cst_18 = arith.constant 5.120000e+02 : f32
    %44 = vector.broadcast %cst_18 : f32 to vector<1x8x1xf32>
    %45 = arith.divf %43, %44 : vector<1x8x1xf32>
    %46 = vector.broadcast %45 : vector<1x8x1xf32> to vector<2x8x256xf32>
    %47 = arith.subf %41, %46 : vector<2x8x256xf32>
    %48 = arith.mulf %47, %47 : vector<2x8x256xf32>
    %cst_19 = arith.constant dense<0.000000e+00> : vector<8xf32>
    %49 = vector.multi_reduction <add>, %48, %cst_19 [0, 2] : vector<2x8x256xf32> to vector<8xf32>
    %50 = vector.shape_cast %49 : vector<8xf32> to vector<1x8x1xf32>
    %cst_20 = arith.constant 5.120000e+02 : f32
    %51 = vector.broadcast %cst_20 : f32 to vector<1x8x1xf32>
    %52 = arith.divf %50, %51 : vector<1x8x1xf32>
    %53 = vector.extract_strided_slice %3 {offsets = [0, 2], sizes = [8, 1], strides = [1, 1]} : vector<8x8xf32> to vector<8x1xf32>
    %54 = vector.shape_cast %53 : vector<8x1xf32> to vector<1x8x1xf32>
    %cst_21 = arith.constant 9.99999974E-6 : f32
    %55 = vector.broadcast %cst_21 : f32 to vector<1x8x1xf32>
    %56 = arith.addf %52, %55 : vector<1x8x1xf32>
    %57 = math.rsqrt %56 : vector<1x8x1xf32>
    %58 = arith.mulf %54, %57 : vector<1x8x1xf32>
    %59 = vector.broadcast %58 : vector<1x8x1xf32> to vector<2x8x256xf32>
    %60 = arith.mulf %47, %59 : vector<2x8x256xf32>
    %61 = vector.extract_strided_slice %3 {offsets = [0, 3], sizes = [8, 1], strides = [1, 1]} : vector<8x8xf32> to vector<8x1xf32>
    %62 = vector.shape_cast %61 : vector<8x1xf32> to vector<1x8x1xf32>
    %63 = vector.broadcast %62 : vector<1x8x1xf32> to vector<2x8x256xf32>
    %64 = arith.addf %60, %63 : vector<2x8x256xf32>
    %cst_22 = arith.constant dense<0.000000e+00> : vector<2x8xf32>
    %65 = vector.multi_reduction <add>, %4, %cst_22 [2] : vector<2x8x256xf32> to vector<2x8xf32>
    %66 = vector.shape_cast %65 : vector<2x8xf32> to vector<2x8x1xf32>
    %cst_23 = arith.constant 2.560000e+02 : f32
    %67 = vector.broadcast %cst_23 : f32 to vector<2x8x1xf32>
    %68 = arith.divf %66, %67 : vector<2x8x1xf32>
    %69 = vector.extract_strided_slice %2 {offsets = [2, 0, 0], sizes = [1, 8, 8], strides = [1, 1, 1]} : vector<4x8x8xf32> to vector<1x8x8xf32>
    %70 = vector.shape_cast %69 : vector<1x8x8xf32> to vector<8x8xf32>
    %71 = vector.extract_strided_slice %70 {offsets = [0, 0], sizes = [8, 1], strides = [1, 1]} : vector<8x8xf32> to vector<8x1xf32>
    %72 = vector.shape_cast %71 : vector<8x1xf32> to vector<1x8x1xf32>
    %73 = vector.extract_strided_slice %68 {offsets = [0, 0, 0], sizes = [2, 1, 1], strides = [1, 1, 1]} : vector<2x8x1xf32> to vector<2x1x1xf32>
    %74 = vector.broadcast %72 : vector<1x8x1xf32> to vector<2x8x1xf32>
    %75 = vector.broadcast %73 : vector<2x1x1xf32> to vector<2x8x1xf32>
    %76 = arith.mulf %74, %75 : vector<2x8x1xf32>
    %77 = vector.extract_strided_slice %70 {offsets = [0, 1], sizes = [8, 1], strides = [1, 1]} : vector<8x8xf32> to vector<8x1xf32>
    %78 = vector.shape_cast %77 : vector<8x1xf32> to vector<1x8x1xf32>
    %79 = vector.extract_strided_slice %68 {offsets = [0, 1, 0], sizes = [2, 1, 1], strides = [1, 1, 1]} : vector<2x8x1xf32> to vector<2x1x1xf32>
    %80 = vector.broadcast %78 : vector<1x8x1xf32> to vector<2x8x1xf32>
    %81 = vector.broadcast %79 : vector<2x1x1xf32> to vector<2x8x1xf32>
    %82 = arith.mulf %80, %81 : vector<2x8x1xf32>
    %83 = arith.addf %76, %82 : vector<2x8x1xf32>
    %84 = vector.extract_strided_slice %70 {offsets = [0, 2], sizes = [8, 1], strides = [1, 1]} : vector<8x8xf32> to vector<8x1xf32>
    %85 = vector.shape_cast %84 : vector<8x1xf32> to vector<1x8x1xf32>
    %86 = vector.extract_strided_slice %68 {offsets = [0, 2, 0], sizes = [2, 1, 1], strides = [1, 1, 1]} : vector<2x8x1xf32> to vector<2x1x1xf32>
    %87 = vector.broadcast %85 : vector<1x8x1xf32> to vector<2x8x1xf32>
    %88 = vector.broadcast %86 : vector<2x1x1xf32> to vector<2x8x1xf32>
    %89 = arith.mulf %87, %88 : vector<2x8x1xf32>
    %90 = arith.addf %83, %89 : vector<2x8x1xf32>
    %91 = vector.extract_strided_slice %70 {offsets = [0, 3], sizes = [8, 1], strides = [1, 1]} : vector<8x8xf32> to vector<8x1xf32>
    %92 = vector.shape_cast %91 : vector<8x1xf32> to vector<1x8x1xf32>
    %93 = vector.extract_strided_slice %68 {offsets = [0, 3, 0], sizes = [2, 1, 1], strides = [1, 1, 1]} : vector<2x8x1xf32> to vector<2x1x1xf32>
    %94 = vector.broadcast %92 : vector<1x8x1xf32> to vector<2x8x1xf32>
    %95 = vector.broadcast %93 : vector<2x1x1xf32> to vector<2x8x1xf32>
    %96 = arith.mulf %94, %95 : vector<2x8x1xf32>
    %97 = arith.addf %90, %96 : vector<2x8x1xf32>
    %98 = vector.extract_strided_slice %70 {offsets = [0, 4], sizes = [8, 1], strides = [1, 1]} : vector<8x8xf32> to vector<8x1xf32>
    %99 = vector.shape_cast %98 : vector<8x1xf32> to vector<1x8x1xf32>
    %100 = vector.extract_strided_slice %68 {offsets = [0, 4, 0], sizes = [2, 1, 1], strides = [1, 1, 1]} : vector<2x8x1xf32> to vector<2x1x1xf32>
    %101 = vector.broadcast %99 : vector<1x8x1xf32> to vector<2x8x1xf32>
    %102 = vector.broadcast %100 : vector<2x1x1xf32> to vector<2x8x1xf32>
    %103 = arith.mulf %101, %102 : vector<2x8x1xf32>
    %104 = arith.addf %97, %103 : vector<2x8x1xf32>
    %105 = vector.extract_strided_slice %70 {offsets = [0, 5], sizes = [8, 1], strides = [1, 1]} : vector<8x8xf32> to vector<8x1xf32>
    %106 = vector.shape_cast %105 : vector<8x1xf32> to vector<1x8x1xf32>
    %107 = vector.extract_strided_slice %68 {offsets = [0, 5, 0], sizes = [2, 1, 1], strides = [1, 1, 1]} : vector<2x8x1xf32> to vector<2x1x1xf32>
    %108 = vector.broadcast %106 : vector<1x8x1xf32> to vector<2x8x1xf32>
    %109 = vector.broadcast %107 : vector<2x1x1xf32> to vector<2x8x1xf32>
    %110 = arith.mulf %108, %109 : vector<2x8x1xf32>
    %111 = arith.addf %104, %110 : vector<2x8x1xf32>
    %112 = vector.extract_strided_slice %70 {offsets = [0, 6], sizes = [8, 1], strides = [1, 1]} : vector<8x8xf32> to vector<8x1xf32>
    %113 = vector.shape_cast %112 : vector<8x1xf32> to vector<1x8x1xf32>
    %114 = vector.extract_strided_slice %68 {offsets = [0, 6, 0], sizes = [2, 1, 1], strides = [1, 1, 1]} : vector<2x8x1xf32> to vector<2x1x1xf32>
    %115 = vector.broadcast %113 : vector<1x8x1xf32> to vector<2x8x1xf32>
    %116 = vector.broadcast %114 : vector<2x1x1xf32> to vector<2x8x1xf32>
    %117 = arith.mulf %115, %116 : vector<2x8x1xf32>
    %118 = arith.addf %111, %117 : vector<2x8x1xf32>
    %119 = vector.extract_strided_slice %70 {offsets = [0, 7], sizes = [8, 1], strides = [1, 1]} : vector<8x8xf32> to vector<8x1xf32>
    %120 = vector.shape_cast %119 : vector<8x1xf32> to vector<1x8x1xf32>
    %121 = vector.extract_strided_slice %68 {offsets = [0, 7, 0], sizes = [2, 1, 1], strides = [1, 1, 1]} : vector<2x8x1xf32> to vector<2x1x1xf32>
    %122 = vector.broadcast %120 : vector<1x8x1xf32> to vector<2x8x1xf32>
    %123 = vector.broadcast %121 : vector<2x1x1xf32> to vector<2x8x1xf32>
    %124 = arith.mulf %122, %123 : vector<2x8x1xf32>
    %125 = arith.addf %118, %124 : vector<2x8x1xf32>
    %cst_24 = arith.constant dense<0.000000e+00> : vector<8xf32>
    %126 = vector.multi_reduction <add>, %125, %cst_24 [0, 2] : vector<2x8x1xf32> to vector<8xf32>
    %127 = vector.shape_cast %126 : vector<8xf32> to vector<1x8x1xf32>
    %cst_25 = arith.constant 2.000000e+00 : f32
    %128 = vector.broadcast %cst_25 : f32 to vector<1x8x1xf32>
    %129 = arith.divf %127, %128 : vector<1x8x1xf32>
    %130 = vector.broadcast %129 : vector<1x8x1xf32> to vector<2x8x1xf32>
    %131 = arith.subf %125, %130 : vector<2x8x1xf32>
    %132 = arith.mulf %131, %131 : vector<2x8x1xf32>
    %cst_26 = arith.constant dense<0.000000e+00> : vector<8xf32>
    %133 = vector.multi_reduction <add>, %132, %cst_26 [0, 2] : vector<2x8x1xf32> to vector<8xf32>
    %134 = vector.shape_cast %133 : vector<8xf32> to vector<1x8x1xf32>
    %cst_27 = arith.constant 2.000000e+00 : f32
    %135 = vector.broadcast %cst_27 : f32 to vector<1x8x1xf32>
    %136 = arith.divf %134, %135 : vector<1x8x1xf32>
    %137 = vector.extract_strided_slice %3 {offsets = [0, 4], sizes = [8, 1], strides = [1, 1]} : vector<8x8xf32> to vector<8x1xf32>
    %138 = vector.shape_cast %137 : vector<8x1xf32> to vector<1x8x1xf32>
    %cst_28 = arith.constant 9.99999974E-6 : f32
    %139 = vector.broadcast %cst_28 : f32 to vector<1x8x1xf32>
    %140 = arith.addf %136, %139 : vector<1x8x1xf32>
    %141 = math.rsqrt %140 : vector<1x8x1xf32>
    %142 = arith.mulf %138, %141 : vector<1x8x1xf32>
    %143 = vector.broadcast %142 : vector<1x8x1xf32> to vector<2x8x1xf32>
    %144 = arith.mulf %131, %143 : vector<2x8x1xf32>
    %145 = vector.extract_strided_slice %3 {offsets = [0, 5], sizes = [8, 1], strides = [1, 1]} : vector<8x8xf32> to vector<8x1xf32>
    %146 = vector.shape_cast %145 : vector<8x1xf32> to vector<1x8x1xf32>
    %147 = vector.broadcast %146 : vector<1x8x1xf32> to vector<2x8x1xf32>
    %148 = arith.addf %144, %147 : vector<2x8x1xf32>
    %cst_29 = arith.constant 0.000000e+00 : f32
    %149 = vector.broadcast %cst_29 : f32 to vector<2x8x1xf32>
    %150 = arith.maximumf %148, %149 : vector<2x8x1xf32>
    %151 = vector.extract_strided_slice %2 {offsets = [3, 0, 0], sizes = [1, 8, 8], strides = [1, 1, 1]} : vector<4x8x8xf32> to vector<1x8x8xf32>
    %152 = vector.shape_cast %151 : vector<1x8x8xf32> to vector<8x8xf32>
    %153 = vector.extract_strided_slice %152 {offsets = [0, 0], sizes = [8, 1], strides = [1, 1]} : vector<8x8xf32> to vector<8x1xf32>
    %154 = vector.shape_cast %153 : vector<8x1xf32> to vector<1x8x1xf32>
    %155 = vector.extract_strided_slice %150 {offsets = [0, 0, 0], sizes = [2, 1, 1], strides = [1, 1, 1]} : vector<2x8x1xf32> to vector<2x1x1xf32>
    %156 = vector.broadcast %154 : vector<1x8x1xf32> to vector<2x8x1xf32>
    %157 = vector.broadcast %155 : vector<2x1x1xf32> to vector<2x8x1xf32>
    %158 = arith.mulf %156, %157 : vector<2x8x1xf32>
    %159 = vector.extract_strided_slice %152 {offsets = [0, 1], sizes = [8, 1], strides = [1, 1]} : vector<8x8xf32> to vector<8x1xf32>
    %160 = vector.shape_cast %159 : vector<8x1xf32> to vector<1x8x1xf32>
    %161 = vector.extract_strided_slice %150 {offsets = [0, 1, 0], sizes = [2, 1, 1], strides = [1, 1, 1]} : vector<2x8x1xf32> to vector<2x1x1xf32>
    %162 = vector.broadcast %160 : vector<1x8x1xf32> to vector<2x8x1xf32>
    %163 = vector.broadcast %161 : vector<2x1x1xf32> to vector<2x8x1xf32>
    %164 = arith.mulf %162, %163 : vector<2x8x1xf32>
    %165 = arith.addf %158, %164 : vector<2x8x1xf32>
    %166 = vector.extract_strided_slice %152 {offsets = [0, 2], sizes = [8, 1], strides = [1, 1]} : vector<8x8xf32> to vector<8x1xf32>
    %167 = vector.shape_cast %166 : vector<8x1xf32> to vector<1x8x1xf32>
    %168 = vector.extract_strided_slice %150 {offsets = [0, 2, 0], sizes = [2, 1, 1], strides = [1, 1, 1]} : vector<2x8x1xf32> to vector<2x1x1xf32>
    %169 = vector.broadcast %167 : vector<1x8x1xf32> to vector<2x8x1xf32>
    %170 = vector.broadcast %168 : vector<2x1x1xf32> to vector<2x8x1xf32>
    %171 = arith.mulf %169, %170 : vector<2x8x1xf32>
    %172 = arith.addf %165, %171 : vector<2x8x1xf32>
    %173 = vector.extract_strided_slice %152 {offsets = [0, 3], sizes = [8, 1], strides = [1, 1]} : vector<8x8xf32> to vector<8x1xf32>
    %174 = vector.shape_cast %173 : vector<8x1xf32> to vector<1x8x1xf32>
    %175 = vector.extract_strided_slice %150 {offsets = [0, 3, 0], sizes = [2, 1, 1], strides = [1, 1, 1]} : vector<2x8x1xf32> to vector<2x1x1xf32>
    %176 = vector.broadcast %174 : vector<1x8x1xf32> to vector<2x8x1xf32>
    %177 = vector.broadcast %175 : vector<2x1x1xf32> to vector<2x8x1xf32>
    %178 = arith.mulf %176, %177 : vector<2x8x1xf32>
    %179 = arith.addf %172, %178 : vector<2x8x1xf32>
    %180 = vector.extract_strided_slice %152 {offsets = [0, 4], sizes = [8, 1], strides = [1, 1]} : vector<8x8xf32> to vector<8x1xf32>
    %181 = vector.shape_cast %180 : vector<8x1xf32> to vector<1x8x1xf32>
    %182 = vector.extract_strided_slice %150 {offsets = [0, 4, 0], sizes = [2, 1, 1], strides = [1, 1, 1]} : vector<2x8x1xf32> to vector<2x1x1xf32>
    %183 = vector.broadcast %181 : vector<1x8x1xf32> to vector<2x8x1xf32>
    %184 = vector.broadcast %182 : vector<2x1x1xf32> to vector<2x8x1xf32>
    %185 = arith.mulf %183, %184 : vector<2x8x1xf32>
    %186 = arith.addf %179, %185 : vector<2x8x1xf32>
    %187 = vector.extract_strided_slice %152 {offsets = [0, 5], sizes = [8, 1], strides = [1, 1]} : vector<8x8xf32> to vector<8x1xf32>
    %188 = vector.shape_cast %187 : vector<8x1xf32> to vector<1x8x1xf32>
    %189 = vector.extract_strided_slice %150 {offsets = [0, 5, 0], sizes = [2, 1, 1], strides = [1, 1, 1]} : vector<2x8x1xf32> to vector<2x1x1xf32>
    %190 = vector.broadcast %188 : vector<1x8x1xf32> to vector<2x8x1xf32>
    %191 = vector.broadcast %189 : vector<2x1x1xf32> to vector<2x8x1xf32>
    %192 = arith.mulf %190, %191 : vector<2x8x1xf32>
    %193 = arith.addf %186, %192 : vector<2x8x1xf32>
    %194 = vector.extract_strided_slice %152 {offsets = [0, 6], sizes = [8, 1], strides = [1, 1]} : vector<8x8xf32> to vector<8x1xf32>
    %195 = vector.shape_cast %194 : vector<8x1xf32> to vector<1x8x1xf32>
    %196 = vector.extract_strided_slice %150 {offsets = [0, 6, 0], sizes = [2, 1, 1], strides = [1, 1, 1]} : vector<2x8x1xf32> to vector<2x1x1xf32>
    %197 = vector.broadcast %195 : vector<1x8x1xf32> to vector<2x8x1xf32>
    %198 = vector.broadcast %196 : vector<2x1x1xf32> to vector<2x8x1xf32>
    %199 = arith.mulf %197, %198 : vector<2x8x1xf32>
    %200 = arith.addf %193, %199 : vector<2x8x1xf32>
    %201 = vector.extract_strided_slice %152 {offsets = [0, 7], sizes = [8, 1], strides = [1, 1]} : vector<8x8xf32> to vector<8x1xf32>
    %202 = vector.shape_cast %201 : vector<8x1xf32> to vector<1x8x1xf32>
    %203 = vector.extract_strided_slice %150 {offsets = [0, 7, 0], sizes = [2, 1, 1], strides = [1, 1, 1]} : vector<2x8x1xf32> to vector<2x1x1xf32>
    %204 = vector.broadcast %202 : vector<1x8x1xf32> to vector<2x8x1xf32>
    %205 = vector.broadcast %203 : vector<2x1x1xf32> to vector<2x8x1xf32>
    %206 = arith.mulf %204, %205 : vector<2x8x1xf32>
    %207 = arith.addf %200, %206 : vector<2x8x1xf32>
    %cst_30 = arith.constant dense<0.000000e+00> : vector<8xf32>
    %208 = vector.multi_reduction <add>, %207, %cst_30 [0, 2] : vector<2x8x1xf32> to vector<8xf32>
    %209 = vector.shape_cast %208 : vector<8xf32> to vector<1x8x1xf32>
    %cst_31 = arith.constant 2.000000e+00 : f32
    %210 = vector.broadcast %cst_31 : f32 to vector<1x8x1xf32>
    %211 = arith.divf %209, %210 : vector<1x8x1xf32>
    %212 = vector.broadcast %211 : vector<1x8x1xf32> to vector<2x8x1xf32>
    %213 = arith.subf %207, %212 : vector<2x8x1xf32>
    %214 = arith.mulf %213, %213 : vector<2x8x1xf32>
    %cst_32 = arith.constant dense<0.000000e+00> : vector<8xf32>
    %215 = vector.multi_reduction <add>, %214, %cst_32 [0, 2] : vector<2x8x1xf32> to vector<8xf32>
    %216 = vector.shape_cast %215 : vector<8xf32> to vector<1x8x1xf32>
    %cst_33 = arith.constant 2.000000e+00 : f32
    %217 = vector.broadcast %cst_33 : f32 to vector<1x8x1xf32>
    %218 = arith.divf %216, %217 : vector<1x8x1xf32>
    %219 = vector.extract_strided_slice %3 {offsets = [0, 6], sizes = [8, 1], strides = [1, 1]} : vector<8x8xf32> to vector<8x1xf32>
    %220 = vector.shape_cast %219 : vector<8x1xf32> to vector<1x8x1xf32>
    %cst_34 = arith.constant 9.99999974E-6 : f32
    %221 = vector.broadcast %cst_34 : f32 to vector<1x8x1xf32>
    %222 = arith.addf %218, %221 : vector<1x8x1xf32>
    %223 = math.rsqrt %222 : vector<1x8x1xf32>
    %224 = arith.mulf %220, %223 : vector<1x8x1xf32>
    %225 = vector.broadcast %224 : vector<1x8x1xf32> to vector<2x8x1xf32>
    %226 = arith.mulf %213, %225 : vector<2x8x1xf32>
    %227 = vector.extract_strided_slice %3 {offsets = [0, 7], sizes = [8, 1], strides = [1, 1]} : vector<8x8xf32> to vector<8x1xf32>
    %228 = vector.shape_cast %227 : vector<8x1xf32> to vector<1x8x1xf32>
    %229 = vector.broadcast %228 : vector<1x8x1xf32> to vector<2x8x1xf32>
    %230 = arith.addf %226, %229 : vector<2x8x1xf32>
    %231 = vector.broadcast %230 : vector<2x8x1xf32> to vector<2x8x256xf32>
    %232 = arith.addf %64, %231 : vector<2x8x256xf32>
    %cst_35 = arith.constant dense<0xFF800000> : vector<2x256xf32>
    %233 = vector.multi_reduction <maximumf>, %232, %cst_35 [1] : vector<2x8x256xf32> to vector<2x256xf32>
    %234 = vector.shape_cast %233 : vector<2x256xf32> to vector<2x1x256xf32>
    %235 = vector.broadcast %234 : vector<2x1x256xf32> to vector<2x8x256xf32>
    %236 = arith.subf %232, %235 : vector<2x8x256xf32>
    %237 = math.exp %236 : vector<2x8x256xf32>
    %cst_36 = arith.constant dense<0.000000e+00> : vector<2x256xf32>
    %238 = vector.multi_reduction <add>, %237, %cst_36 [1] : vector<2x8x256xf32> to vector<2x256xf32>
    %239 = vector.shape_cast %238 : vector<2x256xf32> to vector<2x1x256xf32>
    %240 = tpu.reciprocal %239 : vector<2x1x256xf32> -> vector<2x1x256xf32>
    %241 = vector.broadcast %240 : vector<2x1x256xf32> to vector<2x8x256xf32>
    %242 = arith.mulf %237, %241 : vector<2x8x256xf32>
    %243 = arith.subf %0, %1 : vector<2x8x256xf32>
    %244 = arith.mulf %243, %242 : vector<2x8x256xf32>
    %245 = arith.addf %1, %244 : vector<2x8x256xf32>
    %c0_37 = arith.constant 0 : index
    %c0_38 = arith.constant 0 : index
    %c0_39 = arith.constant 0 : index
    %246 = vector.load %arg5[%c0_37, %c0_38, %c0_39] : memref<2x8x256xf32, #tpu.memory_space<vmem>>, vector<2x8x256xf32>
    tpu.vector_store %arg5[%c0_37, %c0_38, %c0_39], %245 {strides = array<i32>} : memref<2x8x256xf32, #tpu.memory_space<vmem>>, vector<2x8x256xf32>,
    return
  }
  func.func @transform_0(%arg0: i32) -> (i32, i32, i32) {
    %c0_i32 = arith.constant 0 : i32
    %c0_i32_0 = arith.constant 0 : i32
    %c0_i32_1 = arith.constant 0 : i32
    %c0_i32_2 = arith.constant 0 : i32
    return %c0_i32, %c0_i32_0, %c0_i32_1 : i32, i32, i32
  }
  func.func @transform_1(%arg0: i32) -> (i32, i32, i32) {
    %c0_i32 = arith.constant 0 : i32
    %c0_i32_0 = arith.constant 0 : i32
    %c0_i32_1 = arith.constant 0 : i32
    %c0_i32_2 = arith.constant 0 : i32
    return %c0_i32, %c0_i32_0, %c0_i32_1 : i32, i32, i32
  }
  func.func @transform_2(%arg0: i32) -> (i32, i32, i32) {
    %c0_i32 = arith.constant 0 : i32
    %c0_i32_0 = arith.constant 0 : i32
    %c0_i32_1 = arith.constant 0 : i32
    %c0_i32_2 = arith.constant 0 : i32
    return %c0_i32, %c0_i32_0, %c0_i32_1 : i32, i32, i32
  }
  func.func @transform_3(%arg0: i32) -> (i32, i32) {
    %c0_i32 = arith.constant 0 : i32
    %c0_i32_0 = arith.constant 0 : i32
    %c0_i32_1 = arith.constant 0 : i32
    return %c0_i32, %c0_i32_0 : i32, i32
  }
  func.func @transform_4(%arg0: i32) -> (i32, i32, i32) {
    %c0_i32 = arith.constant 0 : i32
    %c0_i32_0 = arith.constant 0 : i32
    %c0_i32_1 = arith.constant 0 : i32
    %c0_i32_2 = arith.constant 0 : i32
    return %c0_i32, %c0_i32_0, %c0_i32_1 : i32, i32, i32
  }
}

</mosaic_0001>

<bundles_post_ra>
// kernel: tpu_custom_call.1
= control target key start
LH: loop header
LB: loop body
LE: loop exit
PB: predicated region body
PF: predicated region fallthrough
CT: control target
= control target key end

     0   :  { %9 = vsyncpa [#allocation3], 0  ;;  %s1348_s0 = inlined_call_operand.hbm [shape: f32[2,8,256], index: 0, kind: input, shape index: {}]   ;;  %s1349_s1 = inlined_call_operand.hbm [shape: f32[2,8,256], index: 1, kind: input, shape index: {}]   ;;  %s1350_s2 = inlined_call_operand.hbm [shape: f32[4,8,8], index: 2, kind: input, shape index: {}]   ;;  %s1351_s3 = inlined_call_operand.hbm [shape: f32[8,8], index: 3, kind: input, shape index: {}]   ;;  %s1352_s4 = inlined_call_operand.hbm [shape: f32[2,8,256], index: 4, kind: output, shape index: {}]  }
   0x1   :  { %10 = vsyncpa [#allocation6], 0 }
   0x2   :  { %11 = vsyncpa [#allocation9], 0 }
   0x3   :  { %12 = vsyncpa [#allocation4], 0  ;;  %s30_s17 = sshll.u32 %s1349_s1, 4  ;;  %s1117_s18 = smov [#allocation5]   ;;  %s31_s17 = int_to_ptr.hbm [resolvable:$true] %s30_s17 }
   0x4   :  { %s32_s19 = sshll.u32 %s1117_s18, 4  ;;  %s17_s22 = sshll.u32 %s1348_s0, 4  ;;  %s33_s19 = int_to_ptr.vmem [resolvable:$true] %s32_s19  ;;  %s18_s22 = int_to_ptr.hbm [resolvable:$true] %s17_s22 }
   0x5   :  { %s1118_s23 = smov 256   ;;  %s1119_s24 = smov 16  }
   0x6   :  { %38 = dma.hbm_to_vmem [thread:$0]  %s31_s17, 512, %s33_s19, [#allocation6], %s1118_s23, %s1118_s23, %s1119_s24  }
   0x7   :  { %s1120_s25 = smov [#allocation2]   ;;  %s43_s1 = sshll.u32 %s1350_s2, 4  ;;  %s44_s1 = int_to_ptr.hbm [resolvable:$true] %s43_s1 }
   0x8   :  { %s19_s26 = sshll.u32 %s1120_s25, 4  ;;  %s1121_s0 = smov [#allocation7]   ;;  %s20_s26 = int_to_ptr.vmem [resolvable:$true] %s19_s26 }
   0x9   :  { %25 = dma.hbm_to_vmem [thread:$0]  %s18_s22, 512, %s20_s26, [#allocation3], %s1118_s23, %s1118_s23, %s1119_s24  }
   0xa   :  { %s45_s29 = sshll.u32 %s1121_s0, 4  ;;  %s57_s6 = sshll.u32 %s1351_s3, 4  ;;  %s46_s29 = int_to_ptr.vmem [resolvable:$true] %s45_s29  ;;  %s58_s6 = int_to_ptr.hbm [resolvable:$true] %s57_s6 }
   0xb   :  { %s1122_s7 = smov 128   ;;  %s1123_s8 = smov 8  }
   0xc   :  { %51 = dma.hbm_to_vmem [thread:$0]  %s44_s1, 512, %s46_s29, [#allocation6], %s1122_s7, %s1122_s7, %s1123_s8  }
   0xd   :  { %s1124_s9 = smov [#allocation8]  }
   0xe   :  { %s59_s10 = sshll.u32 %s1124_s9, 4  ;;  %s60_s10 = int_to_ptr.vmem [resolvable:$true] %s59_s10 }
   0xf   :  { %62 = dma.hbm_to_vmem [thread:$0]  %s58_s6, 128, %s60_s10, [#allocation9]  }
  0x10   :  { %1109 = dma.done.wait [#allocation3], 512  }
  0x11   :  { %1110 = vsyncadd [#allocation3], 4294966784 }
  0x12   :  { %1111 = dma.done.wait [#allocation6], 1024  }
  0x13   :  { %1112 = vsyncadd [#allocation6], 4294966272 }
  0x14   :  { %1113 = dma.done.wait [#allocation9], 128  }
  0x15   :  { %1114 = vsyncadd [#allocation9], 4294967168  ;;  %v79_v0 = vld [vmem:[#allocation2] sm:$0xff]  ;;  %v80_v1 = vld [vmem:[#allocation2 + $0x8] sm:$0xff]  ;;  %vm96_vm0 = vcmask 64512   ;;  %v1125_v15 = vmov 256.0  }
  0x16   :  { %v1190_v2 = vld [vmem:[#allocation5] sm:$0xff]  ;;  %v84_v3 = vld [vmem:[#allocation5 + $0x8] sm:$0xff]  ;;  %v81_v5 = vld [vmem:[#allocation2 + $0x10] sm:$0xff]  ;;  %951 = vrcp.f32 %v1125_v15  ;;  %s1126_s2 = smov 125   ;;  %s1127_s3 = smov 126   ;;  %vm490_vm2 = vcmask 7168  }
  0x17   :  { %v92_v4 = vadd.f32 %v1190_v2, %v79_v0  ;;  %v82_v6 = vld [vmem:[#allocation2 + $0x18] sm:$0xff]  ;;  %v93_v7 = vadd.f32 %v84_v3, %v80_v1  ;;  %v85_v8 = vld [vmem:[#allocation5 + $0x10] sm:$0xff]  ;;  %v87_v12 = vld [vmem:[#allocation7] sm:$0xff]  ;;  %s1128_s11 = smov 127   ;;  %s1129_s12 = smov 122  }
  0x18   :  { %v86_v9 = vld [vmem:[#allocation5 + $0x18] sm:$0xff]  ;;  %v94_v10 = vadd.f32 %v85_v8, %v81_v5  ;;  %v89_v24 = vld [vmem:[#allocation7 + $0x10] sm:$0xff]  ;;  %s1130_s13 = smov 124   ;;  %s1131_s14 = smov 123  }
  0x19   :  { %v95_v11 = vadd.f32 %v86_v9, %v82_v6  ;;  %115 = vmatpush.msra.mxu0 %v92_v4  ;;  %v373_v13 = vadd.f32 %v93_v7, %v92_v4  ;;  %135 = vmatpush.msra.mxu1 %v93_v7  ;;  %s1132_s15 = smov 121   ;;  %s1137_s16 = smov 1  }
  0x1a   :  { %907 = vmatmul.msk.f32.vlgmr.msra.gmra.mxu0 %vm96_vm0, %v87_v12  ;;  %155 = vmatpush.msra.mxu2 %v94_v10  ;;  %s1138_s17 = smov 2   ;;  %s1139_s18 = smov 3  }
  0x1b   :  { %175 = vmatpush.msra.mxu3 %v95_v11  ;;  %374 = vadd.xlane.f32.xlu0 %v373_v13  ;;  %v376_v14 = vadd.f32 %v95_v11, %v94_v10  ;;  %v1133_v13 = vmov 512.0   ;;  %s1140_s19 = smov 4   ;;  %s1141_s20 = smov 5  }
  0x1c   :  { %909 = vmatmul.msk.f32.vlgmr.msra.gmra.mxu2 %vm96_vm0, %v87_v12  ;;  %910 = vmatmul.msk.f32.vlgmr.msra.gmra.mxu3 %vm96_vm0, %v87_v12  ;;  %v952_v16 = vpop.eup %951  ;;  %953 = vrcp.f32 %v1133_v13  ;;  %s1142_s21 = smov 6   ;;  %s1143_s22 = smov 7  }
  0x1d   :  { %908 = vmatmul.msk.f32.vlgmr.msra.gmra.mxu1 %vm96_vm0, %v87_v12  ;;  %v380_v17 = vmul.f32 256.0, %v952_v16  ;;  %vm384_vm1 = vweird.f32 %v952_v16  ;;  %s1146_s25 = smov [#allocation10]   ;;  %s892_s1 = sshll.u32 %s1352_s4, 4  ;;  %s893_s1 = int_to_ptr.hbm [resolvable:$true] %s892_s1 }
  0x1e   :  { %s890_s26 = sshll.u32 %s1146_s25, 4  ;;  %s891_s26 = int_to_ptr.vmem [resolvable:$true] %s890_s26 }
  0x1f   :  { %v381_v18 = vsub.f32 1.0, %v380_v17 }
  0x21   :  { %v382_v19 = vmul.f32 %v952_v16, %v381_v18 }
  0x23   :  { %377 = vadd.xlane.f32.xlu0 %v376_v14  ;;  %v383_v20 = vadd.f32 %v952_v16, %v382_v19  ;;  %v954_v19 = vpop.eup %953 }
  0x24   :  { %vm190_vm3 = vweird.f32 %v954_v19 }
  0x25   :  { %v385_v21 = vsel %vm384_vm1, %v952_v16, %v383_v20 }
  0x8e   :  { %v375_v22 = vpop.xlane.xlu0 %374 }
  0x8f   :  { %v386_v23 = vmul.f32 %v385_v21, %v375_v22 }
  0x91   :  { %v420_v25 = vperm.slane %v386_v23, 3  ;;  %v406_v26 = vperm.slane %v386_v23, 2  ;;  %v392_v27 = vperm.slane %v386_v23, 1  ;;  %v388_v28 = vperm.slane %v386_v23, 0 }
  0x92   :  { %v434_v43 = vperm.slane %v386_v23, 4  ;;  %v448_v47 = vperm.slane %v386_v23, 5  ;;  %v462_v51 = vperm.slane %v386_v23, 6  ;;  %v476_v56 = vperm.slane %v386_v23, 7 }
  0x93   :  { %v422_v29 = vmul.f32 %v420_v25, %v89_v24  ;;  %v408_v30 = vmul.f32 %v406_v26, %v89_v24  ;;  %v394_v31 = vmul.f32 %v392_v27, %v89_v24  ;;  %v1197_v32 = vmul.f32 %v388_v28, %v89_v24 }
  0x94   :  { %v436_v45 = vmul.f32 %v434_v43, %v89_v24  ;;  %v450_v49 = vmul.f32 %v448_v47, %v89_v24  ;;  %v464_v53 = vmul.f32 %v462_v51, %v89_v24  ;;  %v478_v61 = vmul.f32 %v476_v56, %v89_v24 }
  0x95   :  { %426 = vrot.lane.b32.xlu0 %v422_v29, %s1126_s2  ;;  %412 = vrot.lane.b32.xlu2 %v408_v30, %s1127_s3 }
  0x96   :  { %398 = vrot.lane.b32.xlu1 %v394_v31, %s1128_s11  ;;  %v378_v33 = vpop.xlane.xlu0 %377 }
  0x97   :  { %v387_v34 = vmul.f32 %v385_v21, %v378_v33  ;;  %v117_v57 = vpop.f32.mrf.mxu0 }
  0x99   :  { %v463_v35 = vperm.slane %v387_v34, 6  ;;  %v407_v36 = vperm.slane %v387_v34, 2  ;;  %v393_v37 = vperm.slane %v387_v34, 1  ;;  %v389_v38 = vperm.slane %v387_v34, 0 }
  0x9a   :  { %v421_v44 = vperm.slane %v387_v34, 3  ;;  %v435_v48 = vperm.slane %v387_v34, 4  ;;  %v449_v52 = vperm.slane %v387_v34, 5  ;;  %v477_v55 = vperm.slane %v387_v34, 7  ;;  %v137_v58 = vpop.f32.mrf.mxu1 }
  0x9b   :  { %v465_v39 = vmul.f32 %v463_v35, %v89_v24  ;;  %v409_v40 = vmul.f32 %v407_v36, %v89_v24  ;;  %v395_v41 = vmul.f32 %v393_v37, %v89_v24  ;;  %v391_v42 = vmul.f32 %v389_v38, %v89_v24 }
  0x9c   :  { %v423_v46 = vmul.f32 %v421_v44, %v89_v24  ;;  %v437_v50 = vmul.f32 %v435_v48, %v89_v24  ;;  %v451_v54 = vmul.f32 %v449_v52, %v89_v24  ;;  %v479_v59 = vmul.f32 %v477_v55, %v89_v24 }
  0x9d   :  { %470 = vrot.lane.b32.xlu0 %v465_v39, %s1129_s12  ;;  %414 = vrot.lane.b32.xlu2 %v409_v40, %s1127_s3  ;;  %v180_v60 = vadd.f32 %v137_v58, %v117_v57  ;;  %v186_v24 = vmul.f32 512.0, %v954_v19 }
  0x9e   :  { %400 = vrot.lane.b32.xlu1 %v395_v41, %s1128_s11 }
  0x9f   :  { %v157_v62 = vpop.f32.mrf.mxu2  ;;  %v177_v0 = vpop.f32.mrf.mxu3  ;;  %v187_v29 = vsub.f32 1.0, %v186_v24 }
  0xa0   :  { %v181_v63 = vadd.f32 %v180_v60, %v157_v62  ;;  %v1135_v60 = vmov 1  }
  0xa1   :  { %v188_v34 = vmul.f32 %v954_v19, %v187_v29  ;;  %945 = vset.pattern.permute.xlu1 %v1135_v60  ;;  %v88_v60 = vld [vmem:[#allocation7 + $0x8] sm:$0xff] }
  0xa2   :  { %v182_v1 = vadd.f32 %v181_v63, %v177_v0 }
  0xa3   :  { %v189_v39 = vadd.f32 %v954_v19, %v188_v34 }
  0xa5   :  { %440 = vrot.lane.b32.xlu2 %v436_v45, %s1130_s13  ;;  %v1216_v40 = vsel %vm190_vm3, %v954_v19, %v189_v39 }
  0xa6   :  { %428 = vrot.lane.b32.xlu1 %v423_v46, %s1126_s2 }
  0xad   :  { %454 = vrot.lane.b32.xlu2 %v450_v49, %s1131_s14 }
  0xae   :  { %442 = vrot.lane.b32.xlu1 %v437_v50, %s1130_s13 }
  0xb5   :  { %468 = vrot.lane.b32.xlu2 %v464_v53, %s1129_s12 }
  0xb6   :  { %456 = vrot.lane.b32.xlu1 %v451_v54, %s1131_s14  ;;  %v1134_v54 = vmov 2.0  }
  0xb7   :  { %955 = vrcp.f32 %v1134_v54 }
  0xbd   :  { %484 = vrot.lane.b32.xlu2 %v479_v59, %s1132_s15  ;;  %v956_v55 = vpop.eup %955 }
  0xbe   :  { %482 = vrot.lane.b32.xlu1 %v478_v61, %s1132_s15  ;;  %v497_v56 = vmul.f32 2.0, %v956_v55  ;;  %v1219_v61 = vld [vmem:[#allocation8] sm:$0xff]  ;;  %vm501_vm4 = vweird.f32 %v956_v55 }
  0xc0   :  { %v498_v59 = vsub.f32 1.0, %v497_v56 }
  0xc7   :  { %183 = vadd.xlane.f32.xlu0 %v182_v1 }
  0xef   :  { %v413_v3 = vpop.permute.xlu2 %412 }
  0xf7   :  { %v415_v4 = vpop.permute.xlu2 %414 }
  0xff   :  { %v441_v6 = vpop.permute.xlu2 %440 }
 0x107   :  { %v455_v9 = vpop.permute.xlu2 %454  ;;  %v427_v14 = vpop.permute.xlu0 %426 }
 0x108   :  { %v399_v5 = vpop.permute.xlu1 %398 }
 0x109   :  { %v404_v10 = vadd.f32 %v399_v5, %v1197_v32 }
 0x10b   :  { %v418_v11 = vadd.f32 %v413_v3, %v404_v10 }
 0x10d   :  { %v432_v16 = vadd.f32 %v427_v14, %v418_v11 }
 0x10f   :  { %v469_v18 = vpop.permute.xlu2 %468  ;;  %v446_v21 = vadd.f32 %v441_v6, %v432_v16  ;;  %v471_v26 = vpop.permute.xlu0 %470 }
 0x110   :  { %v401_v7 = vpop.permute.xlu1 %400 }
 0x111   :  { %v405_v12 = vadd.f32 %v401_v7, %v391_v42  ;;  %v460_v27 = vadd.f32 %v455_v9, %v446_v21 }
 0x113   :  { %v419_v17 = vadd.f32 %v415_v4, %v405_v12  ;;  %v474_v31 = vadd.f32 %v469_v18, %v460_v27  ;;  %v1136_v4 = vmov 0  }
 0x114   :  { %946 = vset.pattern.permute.xlu2 %v1136_v4 }
 0x117   :  { %v485_v30 = vpop.permute.xlu2 %484 }
 0x118   :  { %v429_v8 = vpop.permute.xlu1 %428 }
 0x119   :  { %v433_v20 = vadd.f32 %v429_v8, %v419_v17 }
 0x120   :  { %v443_v15 = vpop.permute.xlu1 %442 }
 0x121   :  { %v447_v22 = vadd.f32 %v443_v15, %v433_v20 }
 0x128   :  { %v457_v23 = vpop.permute.xlu1 %456 }
 0x129   :  { %v461_v25 = vadd.f32 %v457_v23, %v447_v22 }
 0x12b   :  { %v475_v28 = vadd.f32 %v471_v26, %v461_v25 }
 0x12d   :  { %v489_v32 = vadd.f32 %v485_v30, %v475_v28 }
 0x12f   :  { %v492_v37 = vsel %vm490_vm2, %v489_v32, 0.0 }
 0x130   :  { %v483_v33 = vpop.permute.xlu1 %482 }
 0x131   :  { %v488_v35 = vadd.f32 %v483_v33, %v474_v31 }
 0x133   :  { %v491_v36 = vsel %vm490_vm2, %v488_v35, 0.0 }
 0x134   :  { %v493_v38 = vadd.f32 %v492_v37, %v491_v36 }
 0x136   :  { %494 = vadd.xlane.f32.xlu1 %v493_v38 }
 0x13a   :  { %v184_v41 = vpop.xlane.xlu0 %183 }
 0x13b   :  { %v192_v42 = vmul.f32 %v1216_v40, %v184_v41 }
 0x13d   :  { %v193_v43 = vsub.f32 %v117_v57, %v192_v42  ;;  %v194_v44 = vsub.f32 %v137_v58, %v192_v42  ;;  %v195_v45 = vsub.f32 %v157_v62, %v192_v42  ;;  %v196_v46 = vsub.f32 %v177_v0, %v192_v42 }
 0x13e   :  { %v499_v57 = vmul.f32 %v956_v55, %v498_v59 }
 0x13f   :  { %v197_v47 = vmul.f32 %v193_v43, %v193_v43  ;;  %v198_v48 = vmul.f32 %v194_v44, %v194_v44  ;;  %v199_v49 = vmul.f32 %v195_v45, %v195_v45  ;;  %v200_v50 = vmul.f32 %v196_v46, %v196_v46 }
 0x140   :  { %v500_v58 = vadd.f32 %v956_v55, %v499_v57 }
 0x141   :  { %v201_v51 = vadd.f32 %v198_v48, %v197_v47 }
 0x142   :  { %v1222_v62 = vsel %vm501_vm4, %v956_v55, %v500_v58 }
 0x143   :  { %v202_v52 = vadd.f32 %v201_v51, %v199_v49 }
 0x145   :  { %v203_v53 = vadd.f32 %v202_v52, %v200_v50 }
 0x147   :  { %204 = vadd.xlane.f32.xlu2 %v203_v53 }
 0x14f   :  { %230 = vperm.xlu1 %945, %v1219_v61  }
 0x1a9   :  { %v495_v63 = vpop.xlane.xlu1 %494 }
 0x1aa   :  { %v503_v0 = vmul.f32 %v1222_v62, %v495_v63 }
 0x1ac   :  { %v1225_v1 = vsub.f32 %v488_v35, %v503_v0  ;;  %v1227_v3 = vsub.f32 %v489_v32, %v503_v0 }
 0x1ae   :  { %v506_v5 = vmul.f32 %v1225_v1, %v1225_v1  ;;  %v507_v6 = vmul.f32 %v1227_v3, %v1227_v3 }
 0x1b0   :  { %v508_v7 = vsel %vm490_vm2, %v506_v5, 0.0  ;;  %v509_v8 = vsel %vm490_vm2, %v507_v6, 0.0 }
 0x1b1   :  { %v510_v9 = vadd.f32 %v509_v8, %v508_v7 }
 0x1b3   :  { %511 = vadd.xlane.f32.xlu0 %v510_v9 }
 0x1ba   :  { %v205_v10 = vpop.xlane.xlu2 %204 }
 0x1bb   :  { %v206_v11 = vmul.f32 %v205_v10, %v1216_v40  ;;  %v90_v10 = vld [vmem:[#allocation7 + $0x18] sm:$0xff] }
 0x1bd   :  { %v207_v12 = vadd.f32 1e-05, %v206_v11 }
 0x1bf   :  { %957 = vrsqrt.f32 %v207_v12  ;;  %vm214_vm6 = vweird.f32 %v207_v12 }
 0x1c1   :  { %v231_v25 = vpop.permute.xlu1 %230 }
 0x1c5   :  { %v958_v13 = vpop.eup %957 }
 0x1c6   :  { %v209_v14 = vmul.f32 %v958_v13, %v207_v12  ;;  %vm215_vm5 = vweird.f32 %v958_v13 }
 0x1c7   :  { %vm216_vm7 = vmor %vm214_vm6, %vm215_vm5 }
 0x1c8   :  { %v210_v15 = vmul.f32 %v958_v13, %v209_v14 }
 0x1ca   :  { %v211_v16 = vmul.f32 0.5, %v210_v15 }
 0x1cc   :  { %v212_v17 = vsub.f32 1.5, %v211_v16 }
 0x1ce   :  { %v213_v18 = vmul.f32 %v958_v13, %v212_v17 }
 0x1d0   :  { %v217_v19 = vsel %vm216_vm7, %v958_v13, %v213_v18 }
 0x1d1   :  { %v218_v20 = vmul.f32 %v217_v19, %v1219_v61 }
 0x1d3   :  { %221 = vperm.xlu2 %946, %v218_v20  }
 0x1db   :  { %532 = vrot.lane.b32.xlu2 %v1219_v61, %s1131_s14 }
 0x226   :  { %v512_v21 = vpop.xlane.xlu0 %511 }
 0x227   :  { %v513_v22 = vmul.f32 %v512_v21, %v1222_v62 }
 0x229   :  { %v514_v23 = vadd.f32 1e-05, %v513_v22 }
 0x22b   :  { %959 = vrsqrt.f32 %v514_v23  ;;  %vm521_vm9 = vweird.f32 %v514_v23 }
 0x22d   :  { %v222_v24 = vpop.permute.xlu2 %221 }
 0x22e   :  { %v224_v26 = vmul.f32 %v222_v24, %v193_v43  ;;  %v225_v27 = vmul.f32 %v222_v24, %v194_v44  ;;  %v226_v28 = vmul.f32 %v222_v24, %v195_v45  ;;  %v227_v29 = vmul.f32 %v222_v24, %v196_v46 }
 0x230   :  { %v233_v30 = vadd.f32 %v231_v25, %v224_v26  ;;  %v234_v31 = vadd.f32 %v231_v25, %v225_v27  ;;  %v235_v32 = vadd.f32 %v231_v25, %v226_v28  ;;  %v236_v33 = vadd.f32 %v231_v25, %v227_v29 }
 0x231   :  { %v960_v34 = vpop.eup %959 }
 0x232   :  { %v516_v35 = vmul.f32 %v960_v34, %v514_v23  ;;  %v237_v36 = vmax.f32 %v233_v30, 0.0  ;;  %v238_v37 = vmax.f32 %v234_v31, 0.0  ;;  %v239_v38 = vmax.f32 %v235_v32, 0.0 }
 0x233   :  { %v240_v39 = vmax.f32 %v236_v33, 0.0  ;;  %vm522_vm8 = vweird.f32 %v960_v34 }
 0x234   :  { %v517_v41 = vmul.f32 %v960_v34, %v516_v35  ;;  %259 = vmatpush.msrb.mxu0 %v237_v36  ;;  %279 = vmatpush.msrb.mxu1 %v238_v37  ;;  %vm523_vm10 = vmor %vm521_vm9, %vm522_vm8 }
 0x235   :  { %299 = vmatpush.msrb.mxu2 %v239_v38  ;;  %319 = vmatpush.msrb.mxu3 %v240_v39  ;;  %v533_v48 = vpop.permute.xlu2 %532 }
 0x236   :  { %v518_v42 = vmul.f32 0.5, %v517_v41  ;;  %913 = vmatmul.msk.f32.vlgmr.msrb.gmra.mxu2 %vm96_vm0, %v88_v60  ;;  %914 = vmatmul.msk.f32.vlgmr.msrb.gmra.mxu3 %vm96_vm0, %v88_v60 }
 0x237   :  { %911 = vmatmul.msk.f32.vlgmr.msrb.gmra.mxu0 %vm96_vm0, %v88_v60  ;;  %912 = vmatmul.msk.f32.vlgmr.msrb.gmra.mxu1 %vm96_vm0, %v88_v60 }
 0x238   :  { %v519_v43 = vsub.f32 1.5, %v518_v42 }
 0x23a   :  { %v520_v44 = vmul.f32 %v960_v34, %v519_v43 }
 0x23c   :  { %v524_v45 = vsel %vm523_vm10, %v960_v34, %v520_v44 }
 0x23d   :  { %v525_v46 = vmul.f32 %v524_v45, %v1219_v61 }
 0x23f   :  { %527 = vrot.lane.b32.xlu0 %v525_v46, %s1130_s13 }
 0x2b1   :  { %v528_v47 = vpop.permute.xlu0 %527 }
 0x2b2   :  { %v530_v49 = vmul.f32 %v528_v47, %v1225_v1  ;;  %v531_v50 = vmul.f32 %v528_v47, %v1227_v3 }
 0x2b4   :  { %v535_v51 = vadd.f32 %v533_v48, %v530_v49  ;;  %v536_v52 = vadd.f32 %v533_v48, %v531_v50  ;;  %v261_v39 = vpop.f32.mrf.mxu0  ;;  %v281_v41 = vpop.f32.mrf.mxu1 }
 0x2b5   :  { %v324_v42 = vadd.f32 %v281_v41, %v261_v39 }
 0x2b6   :  { %v1245_v53 = vmax.f32 %v535_v51, 0.0  ;;  %v1247_v54 = vmax.f32 %v536_v52, 0.0 }
 0x2b8   :  { %v544_v55 = vperm.slane %v1247_v54, 1  ;;  %v565_v56 = vperm.slane %v1245_v53, 2  ;;  %v543_v59 = vperm.slane %v1245_v53, 1  ;;  %v587_v57 = vperm.slane %v1245_v53, 3 }
 0x2b9   :  { %v588_v58 = vperm.slane %v1247_v54, 3  ;;  %v566_v63 = vperm.slane %v1247_v54, 2  ;;  %v610_v0 = vperm.slane %v1247_v54, 4  ;;  %v631_v1 = vperm.slane %v1245_v53, 5  ;;  %v301_v43 = vpop.f32.mrf.mxu2  ;;  %v321_v45 = vpop.f32.mrf.mxu3 }
 0x2ba   :  { %549 = vrot.lane.b32.xlu1 %v544_v55, %s1137_s16  ;;  %569 = vrot.lane.b32.xlu2 %v565_v56, %s1138_s17  ;;  %v609_v3 = vperm.slane %v1245_v53, 4  ;;  %v653_v5 = vperm.slane %v1245_v53, 6  ;;  %v654_v6 = vperm.slane %v1247_v54, 6  ;;  %v632_v7 = vperm.slane %v1247_v54, 5 }
 0x2bb   :  { %547 = vrot.lane.b32.xlu0 %v543_v59, %s1137_s16  ;;  %v676_v8 = vperm.slane %v1247_v54, 7  ;;  %v675_v9 = vperm.slane %v1245_v53, 7  ;;  %v325_v44 = vadd.f32 %v324_v42, %v301_v43  ;;  %v539_v51 = vperm.slane %v1245_v53, 0 }
 0x2bc   :  { %v540_v52 = vperm.slane %v1247_v54, 0 }
 0x2bd   :  { %v326_v46 = vadd.f32 %v325_v44, %v321_v45  ;;  %v541_v56 = vmul.f32 %v539_v51, %v90_v10 }
 0x2c2   :  { %591 = vrot.lane.b32.xlu1 %v587_v57, %s1139_s18  ;;  %593 = vrot.lane.b32.xlu2 %v588_v58, %s1139_s18  ;;  %v542_v58 = vmul.f32 %v540_v52, %v90_v10 }
 0x2c3   :  { %571 = vrot.lane.b32.xlu0 %v566_v63, %s1138_s17 }
 0x2ca   :  { %615 = vrot.lane.b32.xlu1 %v610_v0, %s1140_s19  ;;  %635 = vrot.lane.b32.xlu2 %v631_v1, %s1141_s20 }
 0x2cb   :  { %613 = vrot.lane.b32.xlu0 %v609_v3, %s1140_s19 }
 0x2d2   :  { %657 = vrot.lane.b32.xlu1 %v653_v5, %s1142_s21  ;;  %659 = vrot.lane.b32.xlu2 %v654_v6, %s1142_s21 }
 0x2d3   :  { %637 = vrot.lane.b32.xlu0 %v632_v7, %s1141_s20 }
 0x2da   :  { %681 = vrot.lane.b32.xlu1 %v676_v8, %s1143_s22 }
 0x2db   :  { %679 = vrot.lane.b32.xlu0 %v675_v9, %s1143_s22 }
 0x314   :  { %v570_v11 = vpop.permute.xlu2 %569 }
 0x315   :  { %v575_v12 = vmul.f32 %v570_v11, %v90_v10 }
 0x317   :  { %579 = vrot.lane.b32.xlu1 %v575_v12, %s1127_s3 }
 0x31c   :  { %v594_v13 = vpop.permute.xlu2 %593 }
 0x31d   :  { %v598_v14 = vmul.f32 %v594_v13, %v90_v10 }
 0x31f   :  { %603 = vrot.lane.b32.xlu1 %v598_v14, %s1126_s2 }
 0x324   :  { %v636_v15 = vpop.permute.xlu2 %635 }
 0x325   :  { %v641_v16 = vmul.f32 %v636_v15, %v90_v10 }
 0x327   :  { %645 = vrot.lane.b32.xlu1 %v641_v16, %s1131_s14 }
 0x32c   :  { %v550_v17 = vpop.permute.xlu1 %549  ;;  %v660_v18 = vpop.permute.xlu2 %659 }
 0x32d   :  { %v554_v19 = vmul.f32 %v550_v17, %v90_v10  ;;  %v664_v20 = vmul.f32 %v660_v18, %v90_v10  ;;  %v548_v21 = vpop.permute.xlu0 %547 }
 0x32e   :  { %v553_v22 = vmul.f32 %v548_v21, %v90_v10 }
 0x32f   :  { %669 = vrot.lane.b32.xlu1 %v664_v20, %s1129_s12  ;;  %559 = vrot.lane.b32.xlu0 %v554_v19, %s1128_s11 }
 0x330   :  { %557 = vrot.lane.b32.xlu2 %v553_v22, %s1128_s11 }
 0x334   :  { %v592_v23 = vpop.permute.xlu1 %591 }
 0x335   :  { %v597_v24 = vmul.f32 %v592_v23, %v90_v10  ;;  %v572_v25 = vpop.permute.xlu0 %571 }
 0x336   :  { %v576_v26 = vmul.f32 %v572_v25, %v90_v10 }
 0x337   :  { %601 = vrot.lane.b32.xlu0 %v597_v24, %s1126_s2 }
 0x338   :  { %581 = vrot.lane.b32.xlu2 %v576_v26, %s1127_s3 }
 0x33c   :  { %v616_v27 = vpop.permute.xlu1 %615 }
 0x33d   :  { %v620_v28 = vmul.f32 %v616_v27, %v90_v10  ;;  %v614_v29 = vpop.permute.xlu0 %613 }
 0x33e   :  { %v619_v30 = vmul.f32 %v614_v29, %v90_v10 }
 0x33f   :  { %625 = vrot.lane.b32.xlu0 %v620_v28, %s1130_s13 }
 0x340   :  { %623 = vrot.lane.b32.xlu2 %v619_v30, %s1130_s13 }
 0x344   :  { %v658_v31 = vpop.permute.xlu1 %657 }
 0x345   :  { %v663_v32 = vmul.f32 %v658_v31, %v90_v10  ;;  %v638_v33 = vpop.permute.xlu0 %637 }
 0x346   :  { %v642_v34 = vmul.f32 %v638_v33, %v90_v10 }
 0x347   :  { %667 = vrot.lane.b32.xlu0 %v663_v32, %s1129_s12 }
 0x348   :  { %647 = vrot.lane.b32.xlu2 %v642_v34, %s1131_s14 }
 0x34c   :  { %v682_v35 = vpop.permute.xlu1 %681 }
 0x34d   :  { %v686_v36 = vmul.f32 %v682_v35, %v90_v10  ;;  %v680_v37 = vpop.permute.xlu0 %679 }
 0x34e   :  { %v685_v38 = vmul.f32 %v680_v37, %v90_v10 }
 0x34f   :  { %691 = vrot.lane.b32.xlu0 %v686_v36, %s1132_s15 }
 0x350   :  { %689 = vrot.lane.b32.xlu2 %v685_v38, %s1132_s15 }
 0x379   :  { %327 = vadd.xlane.f32.xlu2 %v326_v46  ;;  %v1145_v46 = vmov 3  }
 0x37a   :  { %948 = vset.pattern.permute.xlu0 %v1145_v46 }
 0x389   :  { %v580_v48 = vpop.permute.xlu1 %579 }
 0x38a   :  { %v558_v47 = vpop.permute.xlu2 %557 }
 0x38b   :  { %v563_v57 = vadd.f32 %v558_v47, %v541_v56 }
 0x38d   :  { %v585_v0 = vadd.f32 %v580_v48, %v563_v57 }
 0x391   :  { %v604_v59 = vpop.permute.xlu1 %603 }
 0x392   :  { %v582_v49 = vpop.permute.xlu2 %581 }
 0x399   :  { %v646_v6 = vpop.permute.xlu1 %645 }
 0x39a   :  { %v624_v60 = vpop.permute.xlu2 %623 }
 0x3a1   :  { %v560_v50 = vpop.permute.xlu0 %559  ;;  %v670_v14 = vpop.permute.xlu1 %669 }
 0x3a2   :  { %v564_v63 = vadd.f32 %v560_v50, %v542_v58  ;;  %v648_v7 = vpop.permute.xlu2 %647 }
 0x3a4   :  { %v586_v3 = vadd.f32 %v582_v49, %v564_v63 }
 0x3a6   :  { %v608_v9 = vadd.f32 %v604_v59, %v586_v3 }
 0x3a9   :  { %v602_v55 = vpop.permute.xlu0 %601 }
 0x3aa   :  { %v607_v5 = vadd.f32 %v602_v55, %v585_v0  ;;  %v690_v15 = vpop.permute.xlu2 %689 }
 0x3ac   :  { %v629_v8 = vadd.f32 %v624_v60, %v607_v5 }
 0x3ae   :  { %v651_v53 = vadd.f32 %v646_v6, %v629_v8 }
 0x3b1   :  { %v626_v1 = vpop.permute.xlu0 %625 }
 0x3b2   :  { %v630_v11 = vadd.f32 %v626_v1, %v608_v9 }
 0x3b4   :  { %v652_v13 = vadd.f32 %v648_v7, %v630_v11 }
 0x3b6   :  { %v674_v17 = vadd.f32 %v670_v14, %v652_v13 }
 0x3b9   :  { %v668_v12 = vpop.permute.xlu0 %667 }
 0x3ba   :  { %v673_v54 = vadd.f32 %v668_v12, %v651_v53 }
 0x3bc   :  { %v695_v16 = vadd.f32 %v690_v15, %v673_v54 }
 0x3be   :  { %v697_v19 = vsel %vm490_vm2, %v695_v16, 0.0 }
 0x3c1   :  { %v692_v18 = vpop.permute.xlu0 %691 }
 0x3c2   :  { %v696_v10 = vadd.f32 %v692_v18, %v674_v17 }
 0x3c4   :  { %v698_v20 = vsel %vm490_vm2, %v696_v10, 0.0 }
 0x3c5   :  { %v699_v21 = vadd.f32 %v698_v20, %v697_v19 }
 0x3c7   :  { %700 = vadd.xlane.f32.xlu1 %v699_v21 }
 0x3ec   :  { %v328_v22 = vpop.xlane.xlu2 %327 }
 0x3ed   :  { %v329_v23 = vmul.f32 %v328_v22, %v1216_v40 }
 0x3ef   :  { %v1286_v24 = vsub.f32 %v261_v39, %v329_v23  ;;  %v1288_v25 = vsub.f32 %v281_v41, %v329_v23  ;;  %v1290_v26 = vsub.f32 %v301_v43, %v329_v23  ;;  %v1292_v27 = vsub.f32 %v321_v45, %v329_v23 }
 0x3f0   :  { %v1144_v45 = vmov 2  }
 0x3f1   :  { %v334_v28 = vmul.f32 %v1286_v24, %v1286_v24  ;;  %v335_v29 = vmul.f32 %v1288_v25, %v1288_v25  ;;  %v336_v30 = vmul.f32 %v1290_v26, %v1290_v26  ;;  %v337_v31 = vmul.f32 %v1292_v27, %v1292_v27  ;;  %947 = vset.pattern.permute.xlu1 %v1144_v45 }
 0x3f3   :  { %v338_v32 = vadd.f32 %v335_v29, %v334_v28 }
 0x3f5   :  { %v339_v33 = vadd.f32 %v338_v32, %v336_v30 }
 0x3f7   :  { %v340_v34 = vadd.f32 %v339_v33, %v337_v31 }
 0x3f9   :  { %341 = vadd.xlane.f32.xlu1 %v340_v34 }
 0x43a   :  { %v701_v35 = vpop.xlane.xlu1 %700 }
 0x43b   :  { %v702_v36 = vmul.f32 %v701_v35, %v1222_v62 }
 0x43d   :  { %v703_v37 = vsub.f32 %v695_v16, %v702_v36  ;;  %v704_v38 = vsub.f32 %v696_v10, %v702_v36 }
 0x43f   :  { %v705_v39 = vmul.f32 %v703_v37, %v703_v37  ;;  %v706_v41 = vmul.f32 %v704_v38, %v704_v38 }
 0x441   :  { %v707_v42 = vsel %vm490_vm2, %v705_v39, 0.0  ;;  %v708_v43 = vsel %vm490_vm2, %v706_v41, 0.0 }
 0x442   :  { %v709_v44 = vadd.f32 %v708_v43, %v707_v42 }
 0x444   :  { %710 = vadd.xlane.f32.xlu0 %v709_v44 }
 0x458   :  { %731 = vrot.lane.b32.xlu0 %v1219_v61, %s1132_s15 }
 0x460   :  { %366 = vperm.xlu0 %948, %v1219_v61  }
 0x468   :  { %950 = vset.pattern.permute.xlu0 %v1136_v4 }
 0x46c   :  { %v342_v47 = vpop.xlane.xlu1 %341 }
 0x46d   :  { %v343_v48 = vmul.f32 %v342_v47, %v1216_v40 }
 0x46f   :  { %v344_v49 = vadd.f32 1e-05, %v343_v48 }
 0x471   :  { %961 = vrsqrt.f32 %v344_v49  ;;  %vm351_vm11 = vweird.f32 %v344_v49 }
 0x477   :  { %v962_v50 = vpop.eup %961 }
 0x478   :  { %v346_v51 = vmul.f32 %v962_v50, %v344_v49  ;;  %vm352_vm12 = vweird.f32 %v962_v50 }
 0x479   :  { %vm353_vm13 = vmor %vm351_vm11, %vm352_vm12 }
 0x47a   :  { %v347_v52 = vmul.f32 %v962_v50, %v346_v51 }
 0x47c   :  { %v348_v55 = vmul.f32 0.5, %v347_v52 }
 0x47e   :  { %v349_v56 = vsub.f32 1.5, %v348_v55 }
 0x480   :  { %v350_v59 = vmul.f32 %v962_v50, %v349_v56 }
 0x482   :  { %v354_v60 = vsel %vm353_vm13, %v962_v50, %v350_v59 }
 0x483   :  { %v355_v57 = vmul.f32 %v354_v60, %v1219_v61 }
 0x485   :  { %358 = vperm.xlu1 %947, %v355_v57  }
 0x48d   :  { %949 = vset.pattern.permute.xlu1 %v1136_v4 }
 0x4b7   :  { %v711_v40 = vpop.xlane.xlu0 %710 }
 0x4b8   :  { %v712_v58 = vmul.f32 %v711_v40, %v1222_v62 }
 0x4ba   :  { %v713_v63 = vadd.f32 1e-05, %v712_v58 }
 0x4bc   :  { %963 = vrsqrt.f32 %v713_v63  ;;  %vm720_vm15 = vweird.f32 %v713_v63 }
 0x4c2   :  { %v964_v0 = vpop.eup %963 }
 0x4c3   :  { %v715_v1 = vmul.f32 %v964_v0, %v713_v63  ;;  %vm721_vm14 = vweird.f32 %v964_v0 }
 0x4c4   :  { %vm722_vm0 = vmor %vm720_vm15, %vm721_vm14 }
 0x4c5   :  { %v716_v3 = vmul.f32 %v964_v0, %v715_v1 }
 0x4c7   :  { %v717_v5 = vmul.f32 0.5, %v716_v3 }
 0x4c9   :  { %v718_v6 = vsub.f32 1.5, %v717_v5 }
 0x4ca   :  { %v732_v62 = vpop.permute.xlu0 %731 }
 0x4cb   :  { %v719_v7 = vmul.f32 %v964_v0, %v718_v6 }
 0x4cd   :  { %v723_v8 = vsel %vm722_vm0, %v964_v0, %v719_v7 }
 0x4ce   :  { %v724_v9 = vmul.f32 %v723_v8, %v1219_v61 }
 0x4d0   :  { %726 = vrot.lane.b32.xlu2 %v724_v9, %s1129_s12 }
 0x4d2   :  { %v367_v16 = vpop.permute.xlu0 %366 }
 0x4f7   :  { %v359_v54 = vpop.permute.xlu1 %358 }
 0x4f8   :  { %v361_v14 = vmul.f32 %v359_v54, %v1286_v24  ;;  %v362_v15 = vmul.f32 %v359_v54, %v1288_v25  ;;  %v364_v39 = vmul.f32 %v359_v54, %v1292_v27 }
 0x4fa   :  { %v369_v17 = vadd.f32 %v367_v16, %v361_v14  ;;  %v370_v18 = vadd.f32 %v367_v16, %v362_v15  ;;  %v372_v42 = vadd.f32 %v367_v16, %v364_v39 }
 0x52a   :  { %v727_v4 = vpop.permute.xlu2 %726 }
 0x52b   :  { %v729_v11 = vmul.f32 %v727_v4, %v703_v37  ;;  %v730_v12 = vmul.f32 %v727_v4, %v704_v38  ;;  %v363_v38 = vmul.f32 %v359_v54, %v1290_v26 }
 0x52d   :  { %v734_v53 = vadd.f32 %v732_v62, %v729_v11  ;;  %v735_v13 = vadd.f32 %v732_v62, %v730_v12  ;;  %v371_v41 = vadd.f32 %v367_v16, %v363_v38 }
 0x52f   :  { %738 = vperm.xlu2 %946, %v734_v53   ;;  %743 = vperm.xlu1 %949, %v735_v13  }
 0x589   :  { %v739_v10 = vpop.permute.xlu2 %738 }
 0x58a   :  { %v746_v61 = vadd.f32 %v739_v10, %v369_v17  ;;  %v747_v19 = vadd.f32 %v739_v10, %v370_v18  ;;  %v981_v17 = vld [vmem:[#allocation2] sm:$0xff] }
 0x58b   :  { %v870_v18 = vsub.f32 %v981_v17, %v1190_v2 }
 0x58c   :  { %v750_v20 = vrot.slane %v746_v61, 4  ;;  %v756_v21 = vrot.slane %v747_v19, 4 }
 0x58e   :  { %v751_v22 = vmax.f32 %v746_v61, %v750_v20  ;;  %v757_v23 = vmax.f32 %v747_v19, %v756_v21 }
 0x590   :  { %v752_v28 = vrot.slane %v751_v22, 2  ;;  %v758_v29 = vrot.slane %v757_v23, 2 }
 0x592   :  { %v753_v30 = vmax.f32 %v751_v22, %v752_v28  ;;  %v759_v31 = vmax.f32 %v757_v23, %v758_v29 }
 0x594   :  { %v754_v32 = vrot.slane %v753_v30, 1  ;;  %v760_v33 = vrot.slane %v759_v31, 1 }
 0x596   :  { %v755_v34 = vmax.f32 %v753_v30, %v754_v32  ;;  %v761_v24 = vmax.f32 %v759_v31, %v760_v33  ;;  %v982_v31 = vld [vmem:[#allocation2 + $0x8] sm:$0xff] }
 0x597   :  { %v983_v32 = vld [vmem:[#allocation5 + $0x8] sm:$0xff] }
 0x598   :  { %v774_v35 = vsub.f32 %v746_v61, %v755_v34  ;;  %v775_v25 = vsub.f32 %v747_v19, %v761_v24  ;;  %v871_v33 = vsub.f32 %v982_v31, %v983_v32 }
 0x59a   :  { %v778_v36 = vmul.f32 1.442695, %v774_v35  ;;  %v780_v37 = vmul.f32 1.442695, %v775_v25 }
 0x59c   :  { %965 = vpow2.f32 %v778_v36 }
 0x59d   :  { %967 = vpow2.f32 %v780_v37 }
 0x5a1   :  { %v744_v43 = vpop.permute.xlu1 %743 }
 0x5a2   :  { %v1319_v44 = vpop.eup %965  ;;  %v748_v45 = vadd.f32 %v744_v43, %v371_v41  ;;  %v749_v46 = vadd.f32 %v744_v43, %v372_v42 }
 0x5a3   :  { %v1321_v47 = vpop.eup %967  ;;  %v786_v48 = vrot.slane %v1319_v44, 4 }
 0x5a4   :  { %v792_v49 = vrot.slane %v1321_v47, 4  ;;  %v762_v50 = vrot.slane %v748_v45, 4  ;;  %v768_v51 = vrot.slane %v749_v46, 4 }
 0x5a5   :  { %v787_v26 = vadd.f32 %v1319_v44, %v786_v48 }
 0x5a6   :  { %v793_v27 = vadd.f32 %v1321_v47, %v792_v49  ;;  %v763_v52 = vmax.f32 %v748_v45, %v762_v50  ;;  %v769_v55 = vmax.f32 %v749_v46, %v768_v51 }
 0x5a7   :  { %v788_v56 = vrot.slane %v787_v26, 2 }
 0x5a8   :  { %v794_v59 = vrot.slane %v793_v27, 2  ;;  %v764_v60 = vrot.slane %v763_v52, 2  ;;  %v770_v57 = vrot.slane %v769_v55, 2 }
 0x5a9   :  { %v789_v40 = vadd.f32 %v788_v56, %v787_v26 }
 0x5aa   :  { %v795_v58 = vadd.f32 %v794_v59, %v793_v27  ;;  %v765_v63 = vmax.f32 %v763_v52, %v764_v60  ;;  %v771_v0 = vmax.f32 %v769_v55, %v770_v57  ;;  %v984_v55 = vld [vmem:[#allocation5] sm:$0xff] }
 0x5ab   :  { %v790_v1 = vrot.slane %v789_v40, 1 }
 0x5ac   :  { %v796_v3 = vrot.slane %v795_v58, 1  ;;  %v766_v5 = vrot.slane %v765_v63, 1  ;;  %v772_v6 = vrot.slane %v771_v0, 1 }
 0x5ad   :  { %v791_v7 = vadd.f32 %v790_v1, %v789_v40 }
 0x5ae   :  { %v797_v8 = vadd.f32 %v796_v3, %v795_v58  ;;  %v767_v9 = vmax.f32 %v765_v63, %v766_v5  ;;  %v773_v4 = vmax.f32 %v771_v0, %v772_v6 }
 0x5af   :  { %969 = vrcp.f32 %v791_v7  ;;  %v821_v10 = vand.u32 2147483648, %v791_v7  ;;  %v819_v21 = vand.u32 2147483647, %v791_v7  ;;  %vm815_vm3 = vweird.f32 %v791_v7 }
 0x5b0   :  { %971 = vrcp.f32 %v797_v8  ;;  %v776_v11 = vsub.f32 %v748_v45, %v767_v9  ;;  %v777_v12 = vsub.f32 %v749_v46, %v773_v4  ;;  %v835_v22 = vand.u32 2147483648, %v797_v8 }
 0x5b1   :  { %v833_v30 = vand.u32 2147483647, %v797_v8  ;;  %v822_v35 = vor.u32 1.1754944e-38, %v821_v10  ;;  %vm829_vm5 = vweird.f32 %v797_v8  ;;  %vm820_vm6 = vcmp.eq.f32.partialorder %v819_v21, 8.507059e+37 }
 0x5b2   :  { %v782_v62 = vmul.f32 1.442695, %v776_v11  ;;  %v784_v53 = vmul.f32 1.442695, %v777_v12  ;;  %v836_v38 = vor.u32 1.1754944e-38, %v835_v22  ;;  %v985_v12 = vld [vmem:[#allocation2 + $0x10] sm:$0xff] }
 0x5b3   :  { %vm834_vm8 = vcmp.eq.f32.partialorder %v833_v30, 8.507059e+37 }
 0x5b4   :  { %973 = vpow2.f32 %v782_v62  ;;  %v986_v62 = vld [vmem:[#allocation5 + $0x10] sm:$0xff] }
 0x5b5   :  { %v970_v13 = vpop.eup %969  ;;  %975 = vpow2.f32 %v784_v53  ;;  %v872_v53 = vsub.f32 %v985_v12, %v986_v62 }
 0x5b6   :  { %v972_v54 = vpop.eup %971  ;;  %v811_v14 = vmul.f32 %v970_v13, %v791_v7  ;;  %vm816_vm1 = vweird.f32 %v970_v13 }
 0x5b7   :  { %v825_v15 = vmul.f32 %v972_v54, %v797_v8  ;;  %vm830_vm2 = vweird.f32 %v972_v54  ;;  %vm817_vm4 = vmor %vm815_vm3, %vm816_vm1 }
 0x5b8   :  { %v812_v16 = vsub.f32 1.0, %v811_v14  ;;  %vm831_vm7 = vmor %vm829_vm5, %vm830_vm2  ;;  %v987_v14 = vld [vmem:[#allocation2 + $0x18] sm:$0xff] }
 0x5b9   :  { %v826_v61 = vsub.f32 1.0, %v825_v15  ;;  %v988_v15 = vld [vmem:[#allocation5 + $0x18] sm:$0xff] }
 0x5ba   :  { %v1328_v19 = vpop.eup %973  ;;  %v813_v20 = vmul.f32 %v970_v13, %v812_v16  ;;  %v873_v16 = vsub.f32 %v987_v14, %v988_v15 }
 0x5bb   :  { %v1330_v23 = vpop.eup %975  ;;  %v798_v28 = vrot.slane %v1328_v19, 4  ;;  %v827_v29 = vmul.f32 %v972_v54, %v826_v61 }
 0x5bc   :  { %v804_v2 = vrot.slane %v1330_v23, 4  ;;  %v814_v34 = vadd.f32 %v970_v13, %v813_v20 }
 0x5bd   :  { %v799_v24 = vadd.f32 %v1328_v19, %v798_v28  ;;  %v828_v25 = vadd.f32 %v972_v54, %v827_v29 }
 0x5be   :  { %v805_v36 = vadd.f32 %v1330_v23, %v804_v2  ;;  %v818_v37 = vsel %vm817_vm4, %v970_v13, %v814_v34 }
 0x5bf   :  { %v800_v39 = vrot.slane %v799_v24, 2  ;;  %v823_v41 = vsel %vm820_vm6, %v822_v35, %v818_v37  ;;  %v832_v42 = vsel %vm831_vm7, %v972_v54, %v828_v25 }
 0x5c0   :  { %v806_v43 = vrot.slane %v805_v36, 2  ;;  %v837_v45 = vsel %vm834_vm8, %v836_v38, %v832_v42  ;;  %v866_v46 = vmul.f32 %v1319_v44, %v823_v41 }
 0x5c1   :  { %v801_v48 = vadd.f32 %v800_v39, %v799_v24  ;;  %v867_v49 = vmul.f32 %v1321_v47, %v837_v45 }
 0x5c2   :  { %v807_v50 = vadd.f32 %v806_v43, %v805_v36  ;;  %v874_v51 = vmul.f32 %v870_v18, %v866_v46 }
 0x5c3   :  { %v802_v26 = vrot.slane %v801_v48, 1  ;;  %v875_v27 = vmul.f32 %v871_v33, %v867_v49 }
 0x5c4   :  { %v808_v52 = vrot.slane %v807_v50, 1  ;;  %v878_v56 = vadd.f32 %v984_v55, %v874_v51 }
 0x5c5   :  { %v803_v59 = vadd.f32 %v802_v26, %v801_v48  ;;  %v879_v60 = vadd.f32 %v983_v32, %v875_v27 }
 0x5c6   :  { %v809_v57 = vadd.f32 %v808_v52, %v807_v50  ;;  %882 = vst [vmem:[#allocation10] sm:$0xff] %v878_v56 }
 0x5c7   :  { %977 = vrcp.f32 %v803_v59  ;;  %883 = vst [vmem:[#allocation10 + $0x8] sm:$0xff] %v879_v60  ;;  %v849_v47 = vand.u32 2147483648, %v803_v59  ;;  %v847_v5 = vand.u32 2147483647, %v803_v59  ;;  %vm843_vm11 = vweird.f32 %v803_v59 }
 0x5c8   :  { %979 = vrcp.f32 %v809_v57  ;;  %v863_v6 = vand.u32 2147483648, %v809_v57  ;;  %v861_v8 = vand.u32 2147483647, %v809_v57  ;;  %vm857_vm13 = vweird.f32 %v809_v57 }
 0x5c9   :  { %v850_v4 = vor.u32 1.1754944e-38, %v849_v47  ;;  %vm848_vm14 = vcmp.eq.f32.partialorder %v847_v5, 8.507059e+37 }
 0x5ca   :  { %v864_v54 = vor.u32 1.1754944e-38, %v863_v6  ;;  %vm862_vm0 = vcmp.eq.f32.partialorder %v861_v8, 8.507059e+37 }
 0x5cd   :  { %v978_v40 = vpop.eup %977 }
 0x5ce   :  { %v980_v58 = vpop.eup %979  ;;  %v839_v44 = vmul.f32 %v978_v40, %v803_v59  ;;  %vm844_vm9 = vweird.f32 %v978_v40 }
 0x5cf   :  { %v853_v63 = vmul.f32 %v980_v58, %v809_v57  ;;  %vm858_vm10 = vweird.f32 %v980_v58  ;;  %vm845_vm12 = vmor %vm843_vm11, %vm844_vm9 }
 0x5d0   :  { %v840_v0 = vsub.f32 1.0, %v839_v44  ;;  %vm859_vm15 = vmor %vm857_vm13, %vm858_vm10 }
 0x5d1   :  { %v854_v1 = vsub.f32 1.0, %v853_v63 }
 0x5d2   :  { %v841_v3 = vmul.f32 %v978_v40, %v840_v0 }
 0x5d3   :  { %v855_v7 = vmul.f32 %v980_v58, %v854_v1 }
 0x5d4   :  { %v842_v9 = vadd.f32 %v978_v40, %v841_v3 }
 0x5d5   :  { %v856_v11 = vadd.f32 %v980_v58, %v855_v7 }
 0x5d6   :  { %v846_v13 = vsel %vm845_vm12, %v978_v40, %v842_v9 }
 0x5d7   :  { %v851_v17 = vsel %vm848_vm14, %v850_v4, %v846_v13  ;;  %v860_v18 = vsel %vm859_vm15, %v980_v58, %v856_v11 }
 0x5d8   :  { %v865_v10 = vsel %vm862_vm0, %v864_v54, %v860_v18  ;;  %v868_v61 = vmul.f32 %v1328_v19, %v851_v17 }
 0x5d9   :  { %v869_v20 = vmul.f32 %v1330_v23, %v865_v10 }
 0x5da   :  { %v876_v21 = vmul.f32 %v872_v53, %v868_v61 }
 0x5db   :  { %v877_v22 = vmul.f32 %v873_v16, %v869_v20 }
 0x5dc   :  { %v880_v28 = vadd.f32 %v986_v62, %v876_v21 }
 0x5dd   :  { %v881_v29 = vadd.f32 %v988_v15, %v877_v22 }
 0x5de   :  { %884 = vst [vmem:[#allocation10 + $0x10] sm:$0xff] %v880_v28 }
 0x5df   :  { %885 = vst [vmem:[#allocation10 + $0x18] sm:$0xff] %v881_v29 }
 0x5e0   :  { %898 = dma.vmem_to_hbm [thread:$0]  %s891_s26, 512, %s893_s1, [#allocation4], %s1118_s23, %s1118_s23, %s1119_s24  }
 0x5e1   :  { %1115 = dma.done.wait [#allocation4], 512  }
 0x5e2   :  { %1116 = vsyncadd [#allocation4], 4294966784 }
 0x5e3   :  { %903 = vsyncpa [#allocation3], 1 }
 0x5e4   :  { %904 = vsyncpa [#allocation6], 1 }
 0x5e5   :  { %905 = vsyncpa [#allocation9], 1 }
 0x5e6   :  { %906 = vsyncpa [#allocation4], 1 }

</bundles_post_ra>
